<compile_context>
chip_gen: v5e
topology: v5e:2x2
jax: 0.10.0
libtpu: 0.0.40
codegen_flags: <defaults>
</compile_context>

<pallas_src>
import functools

import jax
import jax.numpy as jnp
from jax.experimental import pallas as pl
from jax.experimental.pallas import tpu as pltpu

BIG = 1e15      # same sentinel constant as the PyTorch code (1000000000000000.0)
_LANES = 128    # TPU lane width


def _round_up(x, m):
    return (x + m - 1) // m * m


def _triplet_kernel(proj_row_ref, proj_col_ref, row_meta_ref, col_meta_ref,
                    out_ref, min_sc, max_sc, *, margin):
    """One (TM, TN) tile of the pairwise score matrix with online min/max.

    proj_row_ref : (TM, Cp)   projected-feature row tile (bf16 or f32)
    proj_col_ref : (TN, Cp)   projected-feature column tile (RHS of the matmul)
    row_meta_ref : (TM, 2)    int32 [:,0]=row label, [:,1]=global row index
    col_meta_ref : (2, TN)    int32 [0,:]=col label, [1,:]=global col index
                              (both -1 on zero-padded columns)
    out_ref      : (TM, 256)  lanes [0,128) = loss, lanes [128,256) = acc
    min_sc/max_sc: (TM, 1)    f32 running hardest-positive / hardest-negative
    """
    j = pl.program_id(1)

    @pl.when(j == 0)
    def _():
        min_sc[...] = jnp.full(min_sc.shape, 2.0 * BIG, jnp.float32)
        max_sc[...] = jnp.full(max_sc.shape, -2.0 * BIG, jnp.float32)

    # --- matcher score tile on the MXU: no materialized transpose, f32 acc ---
    score = jax.lax.dot_general(
        proj_row_ref[...], proj_col_ref[...],
        dimension_numbers=(((1,), (1,)), ((), ())),
        preferred_element_type=jnp.float32)                    # (TM, TN) f32

    rm = row_meta_ref[...]                                     # (TM, 2) int32
    cm = col_meta_ref[...]                                     # (2, TN) int32
    t_row = rm[:, 0:1]                                         # (TM, 1)
    row_g = rm[:, 1:2]                                         # (TM, 1)
    t_col = cm[0:1, :]                                         # (1, TN)
    col_id = cm[1:2, :]                                        # (1, TN)

    same = t_row == t_col                   # pair_labels (broadcast compare)
    diag = row_g == col_id                  # diagonal of the full score matrix
    neg = jnp.logical_and(jnp.logical_not(same), col_id >= 0)  # exclude padding

    # torch: score*pair + (1 - pair + eye)*BIG
    #   same & ~diag -> score ; same & diag -> score + BIG ; different -> BIG
    #   padded columns -> BIG (identical to a negative column, never the min)
    min_val = (jnp.where(same, score, 0.0)
               + jnp.where(jnp.logical_and(same, jnp.logical_not(diag)),
                           0.0, BIG))
    # torch: score*(1-pair) - pair*BIG   (padded columns -> -BIG, excluded)
    max_val = jnp.where(neg, score, -BIG)

    min_sc[...] = jnp.minimum(min_sc[...],
                              jnp.min(min_val, axis=1, keepdims=True))
    max_sc[...] = jnp.maximum(max_sc[...],
                              jnp.max(max_val, axis=1, keepdims=True))

    # --- MarginRankingLoss(margin, reduction='none') epilogue, y = +1 --------
    @pl.when(j == pl.num_programs(1) - 1)
    def _():
        min_pos = min_sc[...]                                  # (TM, 1)
        max_neg = max_sc[...]                                  # (TM, 1)
        loss = jnp.maximum(0.0, max_neg - min_pos + margin)
        acc = (min_pos >= max_neg).astype(jnp.float32)
        rows = loss.shape[0]
        # Lane-dense, unmasked full-width slice stores (no concat temporary).
        out_ref[:, 0:_LANES] = jnp.broadcast_to(loss, (rows, _LANES))
        out_ref[:, _LANES:2 * _LANES] = jnp.broadcast_to(acc, (rows, _LANES))


def triplet_loss_forward(feature, target, matcher_weight, margin=16.0,
                         block_rows=None, block_cols=None, use_bf16=True):
    """Pallas implementation of TripletLoss.forward.

    Args:
      feature: (N, C, H, W) float32  (NCHW, like the PyTorch module)
      target:  (N,) int class labels.  NOTE: labels must be >= 0 (padded
        columns use -1 as a sentinel).
      matcher_weight: (C, C) float32 weight of the synthetic linear matcher
      margin: triplet margin (default 16, as in the module)
      block_rows: rows of the score matrix per grid step (default: 256 if the
        padded batch allows it, else 128; prefer 128 on v5e).
      block_cols: columns of the score matrix per inner ("arbitrary") grid step
        (default: largest of 512/256/128 dividing the padded batch).
      use_bf16: cast matmul operands to bfloat16 (f32 MXU accumulation).

    Returns:
      (loss, acc): both float32 of shape (N,)
    """
    if feature.ndim != 4:
        raise ValueError(
            "expected 4D input (got {}D input)".format(feature.ndim))

    n, c = feature.shape[0], feature.shape[1]

    # Glue kept in XLA: global average pool + matcher-parameter projection.
    pooled = jnp.mean(feature.astype(jnp.float32), axis=(2, 3))          # (N, C)
    proj = jnp.dot(pooled, matcher_weight.astype(jnp.float32))           # (N, C)

    n_pad = _round_up(n, _LANES)               # lane-dense score columns
    c_pad = _round_up(c, _LANES)               # lane-dense contraction dim

    if block_rows is None:
        tm = 256 if n_pad % 256 == 0 else _LANES
    else:
        tm = int(block_rows)
    if block_cols is None:
        tn = 512 if n_pad % 512 == 0 else (256 if n_pad % 256 == 0 else _LANES)
    else:
        tn = int(block_cols)
    tm = min(tm, n_pad)
    tn = min(tn, n_pad)
    if tm % 8 != 0 or n_pad % tm != 0:
        raise ValueError("block_rows must be a multiple of 8 dividing the "
                         "padded batch size")
    if tn % _LANES != 0 or n_pad % tn != 0:
        raise ValueError("block_cols must be a multiple of 128 dividing the "
                         "padded batch size")

    op_dtype = jnp.bfloat16 if use_bf16 else jnp.float32
    # Zero-pad projected features (padded rows/channels contribute nothing).
    proj_p = (jnp.zeros((n_pad, c_pad), jnp.float32)
              .at[:n, :c].set(proj).astype(op_dtype))

    t = target.astype(jnp.int32)
    lbl_pad = jnp.full((n_pad,), -1, jnp.int32).at[:n].set(t)
    row_ids = jnp.arange(n_pad, dtype=jnp.int32)
    col_ids = jnp.full((n_pad,), -1, jnp.int32).at[:n].set(
        jnp.arange(n, dtype=jnp.int32))
    row_meta = jnp.stack([lbl_pad, row_ids], axis=1)       # (n_pad, 2) int32
    col_meta = jnp.stack([lbl_pad, col_ids], axis=0)       # (2, n_pad) int32

    kernel = functools.partial(_triplet_kernel, margin=float(margin))
    grid = (n_pad // tm, n_pad // tn)

    # VMEM budget (bytes): double-buffered inputs + output tile + scratch +
    # a generous allowance for the (TM, TN) score/mask temporaries.
    in_bytes = 2 if use_bf16 else 4
    est = (2 * tm * c_pad * in_bytes + 2 * tn * c_pad * in_bytes
           + 2 * tm * 2 * 4 + 2 * 2 * tn * 4
           + 2 * tm * 2 * _LANES * 4
           + 2 * tm * 1 * 4
           + 6 * tm * tn * 4)
    try:
        phys_vmem = int(pltpu.get_tpu_info().vmem_capacity_bytes)
    except Exception:  # pragma: no cover - conservative fallback (v7x floor)
        phys_vmem = 64 * 1024 * 1024
    cap = (phys_vmem * 3) // 4
    vmem_limit = int(min(max(2 * est, 32 * 1024 * 1024), cap))

    out = pl.pallas_call(
        kernel,
        out_shape=jax.ShapeDtypeStruct((n_pad, 2 * _LANES), jnp.float32),
        grid=grid,
        in_specs=[
            pl.BlockSpec((tm, c_pad), lambda i, j: (i, 0)),   # proj row tile
            pl.BlockSpec((tn, c_pad), lambda i, j: (j, 0)),   # proj column tile
            pl.BlockSpec((tm, 2), lambda i, j: (i, 0)),       # row labels + row ids
            pl.BlockSpec((2, tn), lambda i, j: (0, j)),       # col labels + col ids
        ],
        out_specs=pl.BlockSpec((tm, 2 * _LANES), lambda i, j: (i, 0)),
        scratch_shapes=[pltpu.VMEM((tm, 1), jnp.float32),     # running min_pos
                        pltpu.VMEM((tm, 1), jnp.float32)],    # running max_neg
        compiler_params=pltpu.CompilerParams(
            # Row tiles are independent -> shard across TensorCores; the
            # column axis is an online reduction -> "arbitrary".
            dimension_semantics=("parallel", "arbitrary"),
            vmem_limit_bytes=vmem_limit,
        ),
    )(proj_p, proj_p, row_meta, col_meta)

    loss = out[:n, 0]
    acc = out[:n, _LANES]
    return loss, acc


def _reference(feature, target, matcher_weight, margin=16.0):
    """Pure-JAX reference mirroring the PyTorch semantics exactly."""
    pooled = jnp.mean(feature.astype(jnp.float32), axis=(2, 3))
    proj = pooled @ matcher_weight.astype(jnp.float32)
    score = proj @ proj.T
    t = target.reshape(-1, 1)
    mask = (t == t.T).astype(jnp.float32)
    eye = jnp.eye(score.shape[0], dtype=jnp.float32)
    min_pos = jnp.min(score * mask + (1 - mask + eye) * BIG, axis=1)
    max_neg = jnp.max(score * (1 - mask) - mask * BIG, axis=1)
    loss = jnp.maximum(0.0, -(min_pos - max_neg) + margin)
    acc = (min_pos >= max_neg).astype(jnp.float32)
    return loss, acc, min_pos, max_neg


if __name__ == "__main__":
    key = jax.random.PRNGKey(0)
    k_feat, k_w = jax.random.split(key)

    N, C, H, W = 8, 32, 16, 16
    feature = jax.random.normal(k_feat, (N, C, H, W), dtype=jnp.float32)
    target = jnp.array([0, 0, 1, 1, 2, 2, 3, 3], dtype=jnp.int32)
    # Deterministic matcher parameter (synthetic linear matcher weight).
    matcher_weight = (jax.random.normal(k_w, (C, C), dtype=jnp.float32)
                      / jnp.sqrt(jnp.float32(C)))

    ref_loss, ref_acc, ref_min, ref_max = _reference(
        feature, target, matcher_weight, 16.0)

    # f32-operand path: strict check against the fp32 reference.
    loss, acc = triplet_loss_forward(feature, target, matcher_weight,
                                     margin=16.0, use_bf16=False)
    jax.block_until_ready((loss, acc))
    assert loss.shape == (N,) and acc.shape == (N,)
    assert jnp.allclose(loss, ref_loss, atol=1e-3, rtol=1e-3)
    assert jnp.allclose(acc, ref_acc)

    # bf16-operand path (f32 accumulation): looser tolerance on loss; acc only
    # required to match where the min_pos/max_neg gap is not borderline.
    loss16, acc16 = triplet_loss_forward(feature, target, matcher_weight,
                                         margin=16.0, use_bf16=True)
    jax.block_until_ready((loss16, acc16))
    assert jnp.allclose(loss16, ref_loss, atol=5e-2, rtol=5e-3)
    gap = jnp.abs(ref_min - ref_max)
    assert bool(jnp.all((acc16 == ref_acc) | (gap < 1e-2)))

    print("KERNEL_OK")
</pallas_src>

<mosaic_0001>
module attributes {stable_mosaic.version = 11 : i64} {
  func.func @_triplet_kernel(%arg0: i32, %arg1: i32, %arg2: memref<128x128xf32, #tpu.memory_space<vmem>>, %arg3: memref<128x128xf32, #tpu.memory_space<vmem>>, %arg4: memref<128x2xi32, #tpu.memory_space<vmem>>, %arg5: memref<2x128xi32, #tpu.memory_space<vmem>>, %arg6: memref<128x256xf32, #tpu.memory_space<vmem>>, %arg7: memref<128x1xf32, #tpu.memory_space<vmem>>, %arg8: memref<128x1xf32, #tpu.memory_space<vmem>>) attributes {dimension_semantics = [#tpu.dimension_semantics<parallel>, #tpu.dimension_semantics<arbitrary>], iteration_bounds = array<i64: 1, 1>, scalar_prefetch = 0 : i64, scratch_operands = 2 : i64, tpu.core_type = #tpu.core_type<tc>, window_params = [{transform_indices = @transform_0, window_bounds = array<i64: 128, 128>}, {transform_indices = @transform_1, window_bounds = array<i64: 128, 128>}, {transform_indices = @transform_2, window_bounds = array<i64: 128, 2>}, {transform_indices = @transform_3, window_bounds = array<i64: 2, 128>}, {transform_indices = @transform_4, window_bounds = array<i64: 128, 256>}]} {
    %c0_i32 = arith.constant 0 : i32
    %0 = arith.cmpi eq, %arg1, %c0_i32 : i32
    %1 = arith.extui %0 : i1 to i32
    %c0_i32_0 = arith.constant 0 : i32
    %2 = arith.cmpi ne, %1, %c0_i32_0 : i32
    scf.if %2 {
      %cst_27 = arith.constant 2.000000e+15 : f32
      %46 = vector.broadcast %cst_27 : f32 to vector<128x1xf32>
      %c0_28 = arith.constant 0 : index
      %c0_29 = arith.constant 0 : index
      %47 = vector.load %arg7[%c0_28, %c0_29] : memref<128x1xf32, #tpu.memory_space<vmem>>, vector<128x1xf32>
      tpu.vector_store %arg7[%c0_28, %c0_29], %46 {strides = array<i32>} : memref<128x1xf32, #tpu.memory_space<vmem>>, vector<128x1xf32>,
      %cst_30 = arith.constant -2.000000e+15 : f32
      %48 = vector.broadcast %cst_30 : f32 to vector<128x1xf32>
      %c0_31 = arith.constant 0 : index
      %c0_32 = arith.constant 0 : index
      %49 = vector.load %arg8[%c0_31, %c0_32] : memref<128x1xf32, #tpu.memory_space<vmem>>, vector<128x1xf32>
      tpu.vector_store %arg8[%c0_31, %c0_32], %48 {strides = array<i32>} : memref<128x1xf32, #tpu.memory_space<vmem>>, vector<128x1xf32>,
    } else {
    }
    %c0 = arith.constant 0 : index
    %c0_1 = arith.constant 0 : index
    %3 = vector.load %arg2[%c0, %c0_1] : memref<128x128xf32, #tpu.memory_space<vmem>>, vector<128x128xf32>
    %c0_2 = arith.constant 0 : index
    %c0_3 = arith.constant 0 : index
    %4 = vector.load %arg3[%c0_2, %c0_3] : memref<128x128xf32, #tpu.memory_space<vmem>>, vector<128x128xf32>
    %cst = arith.constant dense<0.000000e+00> : vector<128x128xf32>
    %5 = tpu.matmul %3, %4, %cst {dimension_numbers = #tpu.dot_dimension_numbers<[1], [1], [0], [0], [0, 0, 1, 0], [], []>} : vector<128x128xf32>, vector<128x128xf32>, vector<128x128xf32> -> vector<128x128xf32>
    %c0_4 = arith.constant 0 : index
    %c0_5 = arith.constant 0 : index
    %6 = vector.load %arg4[%c0_4, %c0_5] : memref<128x2xi32, #tpu.memory_space<vmem>>, vector<128x2xi32>
    %c0_6 = arith.constant 0 : index
    %c0_7 = arith.constant 0 : index
    %7 = vector.load %arg5[%c0_6, %c0_7] : memref<2x128xi32, #tpu.memory_space<vmem>>, vector<2x128xi32>
    %8 = vector.extract_strided_slice %6 {offsets = [0, 0], sizes = [128, 1], strides = [1, 1]} : vector<128x2xi32> to vector<128x1xi32>
    %9 = vector.extract_strided_slice %6 {offsets = [0, 1], sizes = [128, 1], strides = [1, 1]} : vector<128x2xi32> to vector<128x1xi32>
    %10 = vector.extract_strided_slice %7 {offsets = [0, 0], sizes = [1, 128], strides = [1, 1]} : vector<2x128xi32> to vector<1x128xi32>
    %11 = vector.extract_strided_slice %7 {offsets = [1, 0], sizes = [1, 128], strides = [1, 1]} : vector<2x128xi32> to vector<1x128xi32>
    %12 = vector.broadcast %8 : vector<128x1xi32> to vector<128x128xi32>
    %13 = vector.broadcast %10 : vector<1x128xi32> to vector<128x128xi32>
    %14 = arith.cmpi eq, %12, %13 : vector<128x128xi32>
    %15 = vector.broadcast %9 : vector<128x1xi32> to vector<128x128xi32>
    %16 = vector.broadcast %11 : vector<1x128xi32> to vector<128x128xi32>
    %17 = arith.cmpi eq, %15, %16 : vector<128x128xi32>
    %cst_8 = arith.constant dense<true> : vector<128x128xi1>
    %18 = arith.xori %14, %cst_8 : vector<128x128xi1>
    %c0_i32_9 = arith.constant 0 : i32
    %19 = vector.broadcast %c0_i32_9 : i32 to vector<1x128xi32>
    %20 = arith.cmpi sge, %11, %19 : vector<1x128xi32>
    %21 = vector.broadcast %20 : vector<1x128xi1> to vector<128x128xi1>
    %22 = arith.andi %18, %21 : vector<128x128xi1>
    %cst_10 = arith.constant 0.000000e+00 : f32
    %23 = vector.broadcast %cst_10 : f32 to vector<128x128xf32>
    %24 = arith.select %14, %5, %23 : vector<128x128xi1>, vector<128x128xf32>
    %cst_11 = arith.constant dense<true> : vector<128x128xi1>
    %25 = arith.xori %17, %cst_11 : vector<128x128xi1>
    %26 = arith.andi %14, %25 : vector<128x128xi1>
    %cst_12 = arith.constant 0.000000e+00 : f32
    %cst_13 = arith.constant 9.99999986E+14 : f32
    %27 = vector.broadcast %cst_12 : f32 to vector<128x128xf32>
    %28 = vector.broadcast %cst_13 : f32 to vector<128x128xf32>
    %29 = arith.select %26, %27, %28 : vector<128x128xi1>, vector<128x128xf32>
    %30 = arith.addf %24, %29 : vector<128x128xf32>
    %cst_14 = arith.constant -9.99999986E+14 : f32
    %31 = vector.broadcast %cst_14 : f32 to vector<128x128xf32>
    %32 = arith.select %22, %5, %31 : vector<128x128xi1>, vector<128x128xf32>
    %c0_15 = arith.constant 0 : index
    %c0_16 = arith.constant 0 : index
    %33 = vector.load %arg7[%c0_15, %c0_16] : memref<128x1xf32, #tpu.memory_space<vmem>>, vector<128x1xf32>
    %cst_17 = arith.constant dense<0x7F800000> : vector<128xf32>
    %34 = vector.multi_reduction <minimumf>, %30, %cst_17 [1] : vector<128x128xf32> to vector<128xf32>
    %35 = vector.shape_cast %34 : vector<128xf32> to vector<128x1xf32>
    %36 = arith.minimumf %33, %35 : vector<128x1xf32>
    %c0_18 = arith.constant 0 : index
    %c0_19 = arith.constant 0 : index
    %37 = vector.load %arg7[%c0_18, %c0_19] : memref<128x1xf32, #tpu.memory_space<vmem>>, vector<128x1xf32>
    tpu.vector_store %arg7[%c0_18, %c0_19], %36 {strides = array<i32>} : memref<128x1xf32, #tpu.memory_space<vmem>>, vector<128x1xf32>,
    %c0_20 = arith.constant 0 : index
    %c0_21 = arith.constant 0 : index
    %38 = vector.load %arg8[%c0_20, %c0_21] : memref<128x1xf32, #tpu.memory_space<vmem>>, vector<128x1xf32>
    %cst_22 = arith.constant dense<0xFF800000> : vector<128xf32>
    %39 = vector.multi_reduction <maximumf>, %32, %cst_22 [1] : vector<128x128xf32> to vector<128xf32>
    %40 = vector.shape_cast %39 : vector<128xf32> to vector<128x1xf32>
    %41 = arith.maximumf %38, %40 : vector<128x1xf32>
    %c0_23 = arith.constant 0 : index
    %c0_24 = arith.constant 0 : index
    %42 = vector.load %arg8[%c0_23, %c0_24] : memref<128x1xf32, #tpu.memory_space<vmem>>, vector<128x1xf32>
    tpu.vector_store %arg8[%c0_23, %c0_24], %41 {strides = array<i32>} : memref<128x1xf32, #tpu.memory_space<vmem>>, vector<128x1xf32>,
    %c0_i32_25 = arith.constant 0 : i32
    %43 = arith.cmpi eq, %arg1, %c0_i32_25 : i32
    %44 = arith.extui %43 : i1 to i32
    %c0_i32_26 = arith.constant 0 : i32
    %45 = arith.cmpi ne, %44, %c0_i32_26 : i32
    scf.if %45 {
      %c0_27 = arith.constant 0 : index
      %c0_28 = arith.constant 0 : index
      %46 = vector.load %arg7[%c0_27, %c0_28] : memref<128x1xf32, #tpu.memory_space<vmem>>, vector<128x1xf32>
      %c0_29 = arith.constant 0 : index
      %c0_30 = arith.constant 0 : index
      %47 = vector.load %arg8[%c0_29, %c0_30] : memref<128x1xf32, #tpu.memory_space<vmem>>, vector<128x1xf32>
      %48 = arith.subf %47, %46 : vector<128x1xf32>
      %cst_31 = arith.constant 1.600000e+01 : f32
      %49 = vector.broadcast %cst_31 : f32 to vector<128x1xf32>
      %50 = arith.addf %48, %49 : vector<128x1xf32>
      %cst_32 = arith.constant 0.000000e+00 : f32
      %51 = vector.broadcast %cst_32 : f32 to vector<128x1xf32>
      %52 = arith.maximumf %51, %50 : vector<128x1xf32>
      %53 = arith.cmpf oge, %46, %47 : vector<128x1xf32>
      %54 = arith.extui %53 : vector<128x1xi1> to vector<128x1xi32>
      %55 = arith.sitofp %54 : vector<128x1xi32> to vector<128x1xf32>
      %56 = vector.shape_cast %52 : vector<128x1xf32> to vector<128x1xf32>
      %57 = vector.broadcast %56 : vector<128x1xf32> to vector<128x128xf32>
      %c0_33 = arith.constant 0 : index
      %c0_34 = arith.constant 0 : index
      %58 = vector.load %arg6[%c0_33, %c0_34] : memref<128x256xf32, #tpu.memory_space<vmem>>, vector<128x128xf32>
      tpu.vector_store %arg6[%c0_33, %c0_34], %57 {strides = array<i32>} : memref<128x256xf32, #tpu.memory_space<vmem>>, vector<128x128xf32>,
      %59 = vector.shape_cast %55 : vector<128x1xf32> to vector<128x1xf32>
      %60 = vector.broadcast %59 : vector<128x1xf32> to vector<128x128xf32>
      %c0_35 = arith.constant 0 : index
      %c128 = arith.constant 128 : index
      %61 = vector.load %arg6[%c0_35, %c128] : memref<128x256xf32, #tpu.memory_space<vmem>>, vector<128x128xf32>
      tpu.vector_store %arg6[%c0_35, %c128], %60 {strides = array<i32>} : memref<128x256xf32, #tpu.memory_space<vmem>>, vector<128x128xf32>,
    } else {
    }
    return
  }
  func.func @transform_0(%arg0: i32, %arg1: i32) -> (i32, i32) {
    %c0_i32 = arith.constant 0 : i32
    %c0_i32_0 = arith.constant 0 : i32
    return %arg0, %c0_i32 : i32, i32
  }
  func.func @transform_1(%arg0: i32, %arg1: i32) -> (i32, i32) {
    %c0_i32 = arith.constant 0 : i32
    %c0_i32_0 = arith.constant 0 : i32
    return %arg1, %c0_i32 : i32, i32
  }
  func.func @transform_2(%arg0: i32, %arg1: i32) -> (i32, i32) {
    %c0_i32 = arith.constant 0 : i32
    %c0_i32_0 = arith.constant 0 : i32
    return %arg0, %c0_i32 : i32, i32
  }
  func.func @transform_3(%arg0: i32, %arg1: i32) -> (i32, i32) {
    %c0_i32 = arith.constant 0 : i32
    %c0_i32_0 = arith.constant 0 : i32
    return %c0_i32, %arg1 : i32, i32
  }
  func.func @transform_4(%arg0: i32, %arg1: i32) -> (i32, i32) {
    %c0_i32 = arith.constant 0 : i32
    %c0_i32_0 = arith.constant 0 : i32
    return %arg0, %c0_i32 : i32, i32
  }
}

</mosaic_0001>

<bundles_post_ra>
// kernel: tpu_custom_call.1
= control target key start
LH: loop header
LB: loop body
LE: loop exit
PB: predicated region body
PF: predicated region fallthrough
CT: control target
= control target key end

     0   :  { %9 = vsyncpa [#allocation5], 0  ;;  %s1798_s0 = inlined_call_operand.vmem [shape: f32[128,128], index: 0, kind: input, shape index: {}]   ;;  %s1799_s1 = inlined_call_operand.hbm [shape: f32[128,128], index: 1, kind: input, shape index: {}]   ;;  %s1800_s2 = inlined_call_operand.vmem [shape: s32[128,2], index: 2, kind: input, shape index: {}]   ;;  %s1801_s3 = inlined_call_operand.vmem [shape: s32[2,128], index: 3, kind: input, shape index: {}]   ;;  %s1802_s4 = inlined_call_operand.hbm [shape: f32[128,256], index: 4, kind: output, shape index: {}]  }
   0x1   :  { %10 = vsyncpa [#allocation6], 0  ;;  %s17_s17 = sshll.u32 %s1799_s1, 4  ;;  %s1127_s18 = smov [#allocation4]   ;;  %s18_s17 = int_to_ptr.hbm [resolvable:$true] %s17_s17 }
   0x2   :  { %s19_s19 = sshll.u32 %s1127_s18, 4  ;;  %s1128_s20 = smov 128   ;;  %s20_s19 = int_to_ptr.vmem [resolvable:$true] %s19_s19 }
   0x3   :  { %s1129_s21 = smov 8  }
   0x4   :  { %25 = dma.hbm_to_vmem [thread:$0]  %s18_s17, 2048, %s20_s19, [#allocation5], %s1128_s20, %s1128_s20, %s1129_s21  }
   0x5   :  { %1123 = dma.done.wait [#allocation5], 2048  }
   0x6   :  { %1124 = vsyncadd [#allocation5], 4294965248  ;;  %v1130_v0 = vmov 1   ;;  %v1131_v1 = vmov 0   ;;  %v1174_v2 = vld [vmem:[%s1800_s2 + $0x20] sm:$0xff]  ;;  %v170_v3 = vld [vmem:[%s1800_s2 + $0x10] sm:$0xff] }
   0x7   :  { %1031 = vset.pattern.permute.xlu0 %v1130_v0  ;;  %1028 = vset.pattern.permute.xlu2 %v1131_v1  ;;  %v102_v4 = vld [vmem:[#allocation4 + $0x78] sm:$0xff]  ;;  %v101_v5 = vld [vmem:[#allocation4 + $0x70] sm:$0xff]  ;;  %v1183_v6 = vld [vmem:[%s1800_s2 + $0x28] sm:$0xff]  ;;  %vm1132_vm2 = vmmov 1   ;;  %v1810_v62 = vmov 0  ;;  %s937_s8 = sshll.u32 %s1802_s4, 4  ;;  %s938_s8 = int_to_ptr.hbm [resolvable:$true] %s937_s8 }
   0x8   :  { %1027 = vset.pattern.permute.xlu1 %v1131_v1  ;;  %198 = vperm.xlu2 %1028, %v1174_v2   ;;  %v175_v7 = vld [vmem:[%s1800_s2 + $0x38] sm:$0xff]  ;;  %v100_v9 = vld [vmem:[#allocation4 + $0x68] sm:$0xff]  ;;  %v99_v10 = vld [vmem:[#allocation4 + $0x60] sm:$0xff]  ;;  %s1138_s9 = smov 256   ;;  %s1139_s10 = smov 16  }
   0x9   :  { %257 = vperm.xlu0 %1031, %v170_v3   ;;  %192 = vperm.xlu1 %1027, %v170_v3   ;;  %v1191_v8 = vld [vmem:[%s1800_s2 + $0x18] sm:$0xff]  ;;  %v1198_v11 = vld [vmem:[%s1800_s2 + $0x40] sm:$0xff]  ;;  %v178_v12 = vld [vmem:[%s1800_s2 + $0x50] sm:$0xff] }
   0xa   :  { %103 = vmatpush.xpose.msra.mxu0 %v102_v4  ;;  %966 = vmatpush.xpose.msra.mxu1 %v102_v4  ;;  %v98_v13 = vld [vmem:[#allocation4 + $0x58] sm:$0xff]  ;;  %v97_v14 = vld [vmem:[#allocation4 + $0x50] sm:$0xff]  ;;  %v181_v16 = vld [vmem:[%s1800_s2 + $0x68] sm:$0xff] }
   0xb   :  { %967 = vmatpush.xpose.msra.mxu2 %v102_v4  ;;  %968 = vmatpush.xpose.msra.mxu3 %v102_v4  ;;  %v1207_v15 = vld [vmem:[%s1800_s2 + $0x58] sm:$0xff]  ;;  %v96_v17 = vld [vmem:[#allocation4 + $0x48] sm:$0xff]  ;;  %v95_v18 = vld [vmem:[#allocation4 + $0x40] sm:$0xff] }
   0xc   :  { %v1216_v19 = vld [vmem:[%s1800_s2 + $0x70] sm:$0xff]  ;;  %v94_v20 = vld [vmem:[#allocation4 + $0x38] sm:$0xff]  ;;  %v168_v21 = vld [vmem:[%s1800_s2] sm:$0xff] }
   0xd   :  { %v93_v22 = vld [vmem:[#allocation4 + $0x30] sm:$0xff]  ;;  %v92_v23 = vld [vmem:[#allocation4 + $0x28] sm:$0xff]  ;;  %v91_v25 = vld [vmem:[#allocation4 + $0x20] sm:$0xff] }
   0xe   :  { %104 = vmatpush.xpose.msra.mxu0 %v101_v5  ;;  %969 = vmatpush.xpose.msra.mxu1 %v101_v5  ;;  %v169_v24 = vld [vmem:[%s1800_s2 + $0x8] sm:$0xff]  ;;  %v90_v26 = vld [vmem:[#allocation4 + $0x18] sm:$0xff]  ;;  %v174_v27 = vld [vmem:[%s1800_s2 + $0x30] sm:$0xff] }
   0xf   :  { %970 = vmatpush.xpose.msra.mxu2 %v101_v5  ;;  %971 = vmatpush.xpose.msra.mxu3 %v101_v5  ;;  %v89_v28 = vld [vmem:[#allocation4 + $0x10] sm:$0xff]  ;;  %v88_v29 = vld [vmem:[#allocation4 + $0x8] sm:$0xff]  ;;  %v87_v31 = vld [vmem:[#allocation4] sm:$0xff] }
  0x10   :  { %201 = vperm.xlu2 %1028, %v1183_v6   ;;  %v177_v30 = vld [vmem:[%s1800_s2 + $0x48] sm:$0xff]  ;;  %v71_v32 = vld [vmem:[%s1798_s0] sm:$0xff]  ;;  %v183_v41 = vld [vmem:[%s1800_s2 + $0x78] sm:$0xff] }
  0x11   :  { %272 = vperm.xlu0 %1031, %v175_v7   ;;  %195 = vperm.xlu1 %1027, %v1191_v8   ;;  %v75_v33 = vld [vmem:[%s1798_s0 + $0x20] sm:$0xff]  ;;  %v72_v37 = vld [vmem:[%s1798_s0 + $0x8] sm:$0xff]  ;;  %v73_v42 = vld [vmem:[%s1798_s0 + $0x10] sm:$0xff] }
  0x12   :  { %105 = vmatpush.xpose.msra.mxu0 %v100_v9  ;;  %972 = vmatpush.xpose.msra.mxu1 %v100_v9  ;;  %v79_v34 = vld [vmem:[%s1798_s0 + $0x40] sm:$0xff]  ;;  %v76_v38 = vld [vmem:[%s1798_s0 + $0x28] sm:$0xff]  ;;  %v77_v43 = vld [vmem:[%s1798_s0 + $0x30] sm:$0xff] }
  0x13   :  { %973 = vmatpush.xpose.msra.mxu2 %v100_v9  ;;  %974 = vmatpush.xpose.msra.mxu3 %v100_v9  ;;  %v83_v35 = vld [vmem:[%s1798_s0 + $0x60] sm:$0xff]  ;;  %v80_v39 = vld [vmem:[%s1798_s0 + $0x48] sm:$0xff]  ;;  %v81_v44 = vld [vmem:[%s1798_s0 + $0x50] sm:$0xff] }
  0x14   :  { %v180_v36 = vld [vmem:[%s1800_s2 + $0x60] sm:$0xff]  ;;  %v84_v40 = vld [vmem:[%s1798_s0 + $0x68] sm:$0xff]  ;;  %v85_v45 = vld [vmem:[%s1798_s0 + $0x70] sm:$0xff] }
  0x15   :  { %v74_v46 = vld [vmem:[%s1798_s0 + $0x18] sm:$0xff]  ;;  %v184_v51 = vld [vmem:[%s1801_s3] sm:$0x3] }
  0x16   :  { %106 = vmatpush.xpose.msra.mxu0 %v99_v10  ;;  %975 = vmatpush.xpose.msra.mxu1 %v99_v10  ;;  %v78_v47 = vld [vmem:[%s1798_s0 + $0x38] sm:$0xff]  ;;  %v1301_v52 = vperm.slane %v184_v51, 1  ;;  %v1303_v53 = vperm.slane %v184_v51, 0 }
  0x17   :  { %976 = vmatpush.xpose.msra.mxu2 %v99_v10  ;;  %977 = vmatpush.xpose.msra.mxu3 %v99_v10  ;;  %v82_v48 = vld [vmem:[%s1798_s0 + $0x58] sm:$0xff] }
  0x18   :  { %210 = vperm.xlu2 %1028, %v1198_v11   ;;  %v86_v49 = vld [vmem:[%s1798_s0 + $0x78] sm:$0xff]  ;;  %s1137_s0 = smov [#allocation7]  }
  0x19   :  { %281 = vperm.xlu0 %1031, %v178_v12   ;;  %207 = vperm.xlu1 %1027, %v175_v7   ;;  %s935_s3 = sshll.u32 %s1137_s0, 4  ;;  %s936_s3 = int_to_ptr.vmem [resolvable:$true] %s935_s3 }
  0x1a   :  { %107 = vmatpush.xpose.msra.mxu0 %v98_v13  ;;  %978 = vmatpush.xpose.msra.mxu1 %v98_v13 }
  0x1b   :  { %979 = vmatpush.xpose.msra.mxu2 %v98_v13  ;;  %980 = vmatpush.xpose.msra.mxu3 %v98_v13 }
  0x1e   :  { %108 = vmatpush.xpose.msra.mxu0 %v97_v14  ;;  %981 = vmatpush.xpose.msra.mxu1 %v97_v14 }
  0x1f   :  { %982 = vmatpush.xpose.msra.mxu2 %v97_v14  ;;  %983 = vmatpush.xpose.msra.mxu3 %v97_v14 }
  0x20   :  { %219 = vperm.xlu2 %1028, %v1207_v15  }
  0x21   :  { %290 = vperm.xlu0 %1031, %v181_v16   ;;  %216 = vperm.xlu1 %1027, %v178_v12  }
  0x22   :  { %109 = vmatpush.xpose.msra.mxu0 %v96_v17  ;;  %984 = vmatpush.xpose.msra.mxu1 %v96_v17 }
  0x23   :  { %985 = vmatpush.xpose.msra.mxu2 %v96_v17  ;;  %986 = vmatpush.xpose.msra.mxu3 %v96_v17 }
  0x26   :  { %110 = vmatpush.xpose.msra.mxu0 %v95_v18  ;;  %987 = vmatpush.xpose.msra.mxu1 %v95_v18 }
  0x27   :  { %988 = vmatpush.xpose.msra.mxu2 %v95_v18  ;;  %989 = vmatpush.xpose.msra.mxu3 %v95_v18 }
  0x28   :  { %228 = vperm.xlu2 %1028, %v1216_v19  }
  0x29   :  { %1032 = vset.pattern.permute.xlu0 %v1131_v1  ;;  %225 = vperm.xlu1 %1027, %v181_v16  }
  0x2a   :  { %111 = vmatpush.xpose.msra.mxu0 %v94_v20  ;;  %990 = vmatpush.xpose.msra.mxu1 %v94_v20 }
  0x2b   :  { %991 = vmatpush.xpose.msra.mxu2 %v94_v20  ;;  %992 = vmatpush.xpose.msra.mxu3 %v94_v20 }
  0x2c   :  { %186 = vperm.xlu0 %1032, %v168_v21  }
  0x2e   :  { %112 = vmatpush.xpose.msra.mxu0 %v93_v22  ;;  %993 = vmatpush.xpose.msra.mxu1 %v93_v22 }
  0x2f   :  { %994 = vmatpush.xpose.msra.mxu2 %v93_v22  ;;  %995 = vmatpush.xpose.msra.mxu3 %v93_v22 }
  0x30   :  { %1030 = vset.pattern.permute.xlu2 %v1130_v0 }
  0x31   :  { %1029 = vset.pattern.permute.xlu1 %v1130_v0  ;;  %254 = vperm.xlu2 %1030, %v169_v24  }
  0x32   :  { %113 = vmatpush.xpose.msra.mxu0 %v92_v23  ;;  %996 = vmatpush.xpose.msra.mxu1 %v92_v23 }
  0x33   :  { %997 = vmatpush.xpose.msra.mxu2 %v92_v23  ;;  %998 = vmatpush.xpose.msra.mxu3 %v92_v23 }
  0x34   :  { %189 = vperm.xlu0 %1032, %v169_v24   ;;  %251 = vperm.xlu1 %1029, %v168_v21  }
  0x36   :  { %114 = vmatpush.xpose.msra.mxu0 %v91_v25  ;;  %999 = vmatpush.xpose.msra.mxu1 %v91_v25 }
  0x37   :  { %1000 = vmatpush.xpose.msra.mxu2 %v91_v25  ;;  %1001 = vmatpush.xpose.msra.mxu3 %v91_v25 }
  0x39   :  { %263 = vperm.xlu2 %1030, %v1174_v2  }
  0x3a   :  { %115 = vmatpush.xpose.msra.mxu0 %v90_v26  ;;  %1002 = vmatpush.xpose.msra.mxu1 %v90_v26 }
  0x3b   :  { %1003 = vmatpush.xpose.msra.mxu2 %v90_v26  ;;  %1004 = vmatpush.xpose.msra.mxu3 %v90_v26 }
  0x3c   :  { %204 = vperm.xlu0 %1032, %v174_v27   ;;  %260 = vperm.xlu1 %1029, %v1191_v8  }
  0x3e   :  { %116 = vmatpush.xpose.msra.mxu0 %v89_v28  ;;  %1005 = vmatpush.xpose.msra.mxu1 %v89_v28 }
  0x3f   :  { %1006 = vmatpush.xpose.msra.mxu2 %v89_v28  ;;  %1007 = vmatpush.xpose.msra.mxu3 %v89_v28 }
  0x41   :  { %269 = vperm.xlu2 %1030, %v174_v27  }
  0x42   :  { %117 = vmatpush.xpose.msra.mxu0 %v88_v29  ;;  %1008 = vmatpush.xpose.msra.mxu1 %v88_v29 }
  0x43   :  { %1009 = vmatpush.xpose.msra.mxu2 %v88_v29  ;;  %1010 = vmatpush.xpose.msra.mxu3 %v88_v29 }
  0x44   :  { %213 = vperm.xlu0 %1032, %v177_v30   ;;  %266 = vperm.xlu1 %1029, %v1183_v6  }
  0x46   :  { %118 = vmatpush.xpose.msra.mxu0 %v87_v31  ;;  %1011 = vmatpush.xpose.msra.mxu1 %v87_v31 }
  0x47   :  { %1012 = vmatpush.xpose.msra.mxu2 %v87_v31  ;;  %1013 = vmatpush.xpose.msra.mxu3 %v87_v31  ;;  %v1133_v31 = vmov 1e+15  }
  0x49   :  { %119 = vmatmul.f32.vlgmr.msra.gmra.mxu0 %v71_v32  ;;  %131 = vmatmul.f32.vlgmr.msra.gmra.mxu1 %v75_v33 }
  0x4a   :  { %143 = vmatmul.f32.vlgmr.msra.gmra.mxu2 %v79_v34  ;;  %155 = vmatmul.f32.vlgmr.msra.gmra.mxu3 %v83_v35 }
  0x4b   :  { %278 = vperm.xlu2 %1030, %v177_v30  }
  0x4c   :  { %222 = vperm.xlu0 %1032, %v180_v36   ;;  %275 = vperm.xlu1 %1029, %v1198_v11  }
  0x51   :  { %122 = vmatmul.f32.gmra.mxu0 %v72_v37  ;;  %134 = vmatmul.f32.gmra.mxu1 %v76_v38 }
  0x52   :  { %146 = vmatmul.f32.gmra.mxu2 %v80_v39  ;;  %158 = vmatmul.f32.gmra.mxu3 %v84_v40 }
  0x53   :  { %287 = vperm.xlu2 %1030, %v180_v36  }
  0x54   :  { %231 = vperm.xlu0 %1032, %v183_v41   ;;  %284 = vperm.xlu1 %1029, %v1207_v15  }
  0x59   :  { %125 = vmatmul.f32.gmra.mxu0 %v73_v42  ;;  %137 = vmatmul.f32.gmra.mxu1 %v77_v43 }
  0x5a   :  { %149 = vmatmul.f32.gmra.mxu2 %v81_v44  ;;  %161 = vmatmul.f32.gmra.mxu3 %v85_v45 }
  0x5b   :  { %296 = vperm.xlu2 %1030, %v183_v41  }
  0x5c   :  { %293 = vperm.xlu1 %1029, %v1216_v19  }
  0x61   :  { %128 = vmatmul.f32.gmra.mxu0 %v74_v46  ;;  %140 = vmatmul.f32.gmra.mxu1 %v78_v47 }
  0x62   :  { %152 = vmatmul.f32.gmra.mxu2 %v82_v48  ;;  %164 = vmatmul.f32.gmra.mxu3 %v86_v49  ;;  %v1296_v50 = vpop.permute.xlu2 %198 }
  0x63   :  { %1034 = vset.pattern.permute.xlu2 %v1131_v1 }
  0x64   :  { %1033 = vset.pattern.permute.xlu1 %v1131_v1 }
  0x6a   :  { %v1311_v56 = vpop.permute.xlu2 %201 }
  0x72   :  { %v1322_v60 = vpop.permute.xlu2 %210 }
  0x7a   :  { %v1338_v0 = vpop.permute.xlu2 %219 }
  0x7b   :  { %v258_v54 = vpop.permute.xlu0 %257  ;;  %v1305_v55 = vpop.permute.xlu1 %192 }
  0x7c   :  { %vm301_vm0 = vcmp.eq.s32.totalorder %v258_v54, %v1301_v52  ;;  %vm1806_vm1 = vcmp.eq.s32.totalorder %v1305_v55, %v1303_v53 }
  0x7d   :  { %vm369_vm3 = vmxor %vm301_vm0, %vm1132_vm2 }
  0x7e   :  { %vm1316_vm4 = vmand %vm1806_vm1, %vm369_vm3  ;;  %vm331_vm3 = vcmp.ge.s32.totalorder %v184_v51, 0 }
  0x7f   :  { %v332_v17 = vsel %vm331_vm3, 1, %v1131_v1 }
  0x80   :  { %v333_v18 = vperm.slane %v332_v17, 1 }
  0x82   :  { %v1354_v5 = vpop.permute.xlu2 %228 }
  0x83   :  { %v1320_v58 = vpop.permute.xlu1 %195  ;;  %v273_v59 = vpop.permute.xlu0 %272 }
  0x84   :  { %vm306_vm5 = vcmp.eq.s32.totalorder %v273_v59, %v1301_v52  ;;  %vm1804_vm14 = vcmp.eq.s32.totalorder %v1320_v58, %v1303_v53 }
  0x85   :  { %vm374_vm6 = vmxor %vm306_vm5, %vm1132_vm2  ;;  %vm1807_vm5 = vcmp.eq.s32.totalorder %v1296_v50, %v1303_v53 }
  0x8b   :  { %v1326_v61 = vpop.permute.xlu1 %207  ;;  %v282_v63 = vpop.permute.xlu0 %281 }
  0x8c   :  { %vm1803_vm7 = vcmp.eq.s32.totalorder %v1326_v61, %v1303_v53  ;;  %vm309_vm9 = vcmp.eq.s32.totalorder %v282_v63, %v1301_v52  ;;  %v1358_v8 = vpop.permute.xlu2 %254 }
  0x8d   :  { %vm1333_vm8 = vmand %vm1803_vm7, %vm374_vm6 }
  0x8e   :  { %v1811_v62 = vsel %vm1333_vm8, 4294967295, %v1810_v62  ;;  %vm377_vm10 = vmxor %vm309_vm9, %vm1132_vm2  ;;  %vm1385_vm9 = vcmp.eq.s32.totalorder %v333_v18, 1 }
  0x93   :  { %v1341_v2 = vpop.permute.xlu1 %216  ;;  %v1352_v4 = vpop.permute.xlu0 %290 }
  0x94   :  { %vm1805_vm11 = vcmp.eq.s32.totalorder %v1341_v2, %v1303_v53  ;;  %v264_v12 = vpop.permute.xlu2 %263 }
  0x95   :  { %vm1348_vm12 = vmand %vm1805_vm11, %vm377_vm10 }
  0x96   :  { %vm319_vm10 = vmxor %vm1807_vm5, %vm1132_vm2 }
  0x97   :  { %vm339_vm7 = vmand %vm319_vm10, %vm1385_vm9 }
  0x9b   :  { %v1356_v6 = vpop.permute.xlu1 %225 }
  0x9c   :  { %v1375_v15 = vpop.permute.xlu2 %269 }
  0x9e   :  { %v187_v7 = vpop.permute.xlu0 %186 }
  0x9f   :  { %vm234_vm6 = vcmp.eq.s32.totalorder %v187_v7, %v1303_v53 }
  0xa5   :  { %v1389_v21 = vpop.permute.xlu2 %278 }
  0xa6   :  { %v252_v9 = vpop.permute.xlu1 %251  ;;  %v1360_v10 = vpop.permute.xlu0 %189 }
  0xad   :  { %v288_v29 = vpop.permute.xlu2 %287 }
  0xae   :  { %v261_v11 = vpop.permute.xlu1 %260  ;;  %v1373_v14 = vpop.permute.xlu0 %204 }
  0xaf   :  { %vm302_vm13 = vcmp.eq.s32.totalorder %v261_v11, %v1301_v52 }
  0xb0   :  { %vm370_vm15 = vmxor %vm302_vm13, %vm1132_vm2 }
  0xb1   :  { %vm1369_vm0 = vmand %vm1804_vm14, %vm370_vm15  ;;  %vm299_vm15 = vcmp.eq.s32.totalorder %v252_v9, %v1301_v52  ;;  %vm242_vm14 = vcmp.eq.s32.totalorder %v1322_v60, %v1303_v53  ;;  %v409_v9 = vsel %vm1348_vm12, 0.0, %v1133_v31  ;;  %vm1830_vm12 = vcmp.eq.s32.totalorder %v1320_v58, %v1303_v53 }
  0xb2   :  { %vm315_vm13 = vmxor %vm234_vm6, %vm1132_vm2 }
  0xb3   :  { %vm335_vm11 = vmand %vm315_vm13, %vm1385_vm9  ;;  %vm311_vm13 = vcmp.eq.s32.totalorder %v288_v29, %v1301_v52 }
  0xb4   :  { %vm367_vm1 = vmxor %vm299_vm15, %vm1132_vm2 }
  0xb5   :  { %vm1412_vm10 = vmxor %vm242_vm14, %vm1132_vm2 }
  0xb6   :  { %v1377_v16 = vpop.permute.xlu1 %266  ;;  %v1383_v19 = vpop.permute.xlu0 %213  ;;  %vm383_vm8 = vmand %vm234_vm6, %vm367_vm1 }
  0xb7   :  { %vm343_vm1 = vmand %vm1412_vm10, %vm1385_vm9  ;;  %v399_v32 = vsel %vm383_vm8, 0.0, %v1133_v31  ;;  %vm235_vm10 = vcmp.eq.s32.totalorder %v1360_v10, %v1303_v53 }
  0xbe   :  { %v276_v22 = vpop.permute.xlu1 %275  ;;  %v223_v27 = vpop.permute.xlu0 %222 }
  0xbf   :  { %vm307_vm3 = vcmp.eq.s32.totalorder %v276_v22, %v1301_v52  ;;  %vm246_vm15 = vcmp.eq.s32.totalorder %v223_v27, %v1303_v53  ;;  %v402_v22 = vsel %vm1369_vm0, 0.0, %v1133_v31  ;;  %vm1831_vm0 = vcmp.eq.s32.totalorder %v1326_v61, %v1303_v53 }
  0xc0   :  { %vm375_vm5 = vmxor %vm307_vm3, %vm1132_vm2 }
  0xc6   :  { %v120_v1 = vpop.f32.mrf.mxu0  ;;  %v132_v24 = vpop.f32.mrf.mxu1 }
  0xc7   :  { %v431_v23 = vsel %vm335_vm11, %v120_v1, -1e+15  ;;  %v435_v25 = vsel %vm339_vm7, %v132_v24, -1e+15  ;;  %vm391_vm11 = vmand %vm242_vm14, %vm375_vm5  ;;  %v351_v28 = vsel %vm234_vm6, %v120_v1, 0.0  ;;  %vm303_vm7 = vcmp.eq.s32.totalorder %v264_v12, %v1301_v52 }
  0xc8   :  { %544 = vmax.xlane.f32.xlu0 %v431_v23  ;;  %552 = vmax.xlane.f32.xlu1 %v435_v25  ;;  %v407_v36 = vsel %vm391_vm11, 0.0, %v1133_v31  ;;  %v415_v37 = vadd.f32 %v399_v32, %v351_v28  ;;  %vm371_vm5 = vmxor %vm303_vm7, %vm1132_vm2  ;;  %vm300_vm7 = vcmp.eq.s32.totalorder %v1358_v8, %v1301_v52 }
  0xc9   :  { %vm379_vm6 = vmxor %vm311_vm13, %vm1132_vm2 }
  0xca   :  { %vm395_vm8 = vmand %vm246_vm15, %vm379_vm6  ;;  %vm1822_vm6 = vcmp.eq.s32.totalorder %v1305_v55, %v1303_v53 }
  0xcb   :  { %v411_v43 = vsel %vm395_vm8, 0.0, %v1133_v31  ;;  %vm316_vm13 = vmxor %vm235_vm10, %vm1132_vm2 }
  0xcc   :  { %vm336_vm8 = vmand %vm316_vm13, %vm1385_vm9 }
  0xcd   :  { %v144_v30 = vpop.f32.mrf.mxu2  ;;  %v156_v38 = vpop.f32.mrf.mxu3 }
  0xce   :  { %v359_v33 = vsel %vm242_vm14, %v144_v30, 0.0  ;;  %v439_v34 = vsel %vm343_vm1, %v144_v30, -1e+15  ;;  %v123_v35 = vpop.f32.mrf.mxu0  ;;  %v135_v40 = vpop.f32.mrf.mxu1  ;;  %vm1820_vm14 = vcmp.eq.s32.totalorder %v1296_v50, %v1303_v53  ;;  %v363_v41 = vsel %vm246_vm15, %v156_v38, 0.0 }
  0xcf   :  { %560 = vmax.xlane.f32.xlu2 %v439_v34  ;;  %v423_v39 = vadd.f32 %v407_v36, %v359_v33  ;;  %vm387_vm3 = vmand %vm1820_vm14, %vm371_vm5  ;;  %v427_v45 = vadd.f32 %v411_v43, %v363_v41  ;;  %vm239_vm1 = vcmp.eq.s32.totalorder %v1311_v56, %v1303_v53  ;;  %v401_v50 = vsel %vm1316_vm4, 0.0, %v1133_v31  ;;  %v1586_v56 = vpop.permute.xlu1 %284 }
  0xd0   :  { %463 = vmin.xlane.f32.xlu0 %v415_v37  ;;  %vm1821_vm11 = vmmov %vm1820_vm14  ;;  %v403_v46 = vsel %vm387_vm3, 0.0, %v1133_v31  ;;  %v432_v59 = vsel %vm336_vm8, %v123_v35, -1e+15  ;;  %vm308_vm4 = vcmp.eq.s32.totalorder %v1389_v21, %v1301_v52  ;;  %v352_v7 = vsel %vm235_vm10, %v123_v35, 0.0 }
  0xd1   :  { %479 = vmin.xlane.f32.xlu1 %v423_v39  ;;  %v355_v42 = vsel %vm1821_vm11, %v132_v24, 0.0  ;;  %vm368_vm5 = vmxor %vm300_vm7, %vm1132_vm2  ;;  %v1134_v43 = vmov -2e+15  }
  0xd2   :  { %v419_v48 = vadd.f32 %v403_v46, %v355_v42  ;;  %vm320_vm14 = vmxor %vm239_vm1, %vm1132_vm2 }
  0xd3   :  { %vm1484_vm3 = vmand %vm235_vm10, %vm368_vm5  ;;  %vm243_vm5 = vcmp.eq.s32.totalorder %v1383_v19, %v1303_v53 }
  0xd4   :  { %vm1493_vm11 = vmxor %vm246_vm15, %vm1132_vm2  ;;  %vm304_vm15 = vcmp.eq.s32.totalorder %v1377_v16, %v1301_v52  ;;  %v400_v3 = vsel %vm1484_vm3, 0.0, %v1133_v31  ;;  %vm1832_vm3 = vnez %v1811_v62  ;;  %v356_v62 = vsel %vm239_vm1, %v135_v40, 0.0 }
  0xd5   :  { %v147_v44 = vpop.f32.mrf.mxu2  ;;  %vm340_vm7 = vmand %vm320_vm14, %vm1385_vm9  ;;  %v416_v23 = vadd.f32 %v400_v3, %v352_v7  ;;  %v406_v25 = vsel %vm1832_vm3, 0.0, %v1133_v31  ;;  %v159_v30 = vpop.f32.mrf.mxu3  ;;  %vm305_vm3 = vcmp.eq.s32.totalorder %v1375_v15, %v1301_v52 }
  0xd6   :  { %v1461_v47 = vpop.f32.mrf.mxu0  ;;  %v1471_v51 = vpop.f32.mrf.mxu1  ;;  %vm1500_vm13 = vmxor %vm308_vm4, %vm1132_vm2  ;;  %v436_v12 = vsel %vm340_vm7, %v135_v40, -1e+15  ;;  %v360_v26 = vsel %vm243_vm5, %v147_v44, 0.0  ;;  %vm312_vm7 = vcmp.eq.s32.totalorder %v1352_v4, %v1301_v52 }
  0xd7   :  { %487 = vmin.xlane.f32.xlu2 %v427_v45  ;;  %v353_v49 = vsel %vm1822_vm6, %v1461_v47, 0.0  ;;  %vm1829_vm6 = vcmp.eq.s32.totalorder %v1341_v2, %v1303_v53  ;;  %vm347_vm10 = vmand %vm1493_vm11, %vm1385_vm9  ;;  %v294_v36 = vpop.permute.xlu1 %293 }
  0xd8   :  { %471 = vmin.xlane.f32.xlu0 %v419_v48  ;;  %v1475_v54 = vadd.f32 %v401_v50, %v353_v49  ;;  %v443_v18 = vsel %vm347_vm10, %v156_v38, -1e+15  ;;  %vm392_vm8 = vmand %vm243_vm5, %vm1500_vm13  ;;  %v297_v48 = vpop.permute.xlu2 %296 }
  0xd9   :  { %546 = vmax.xlane.f32.xlu1 %v432_v59  ;;  %vm372_vm14 = vmxor %vm304_vm15, %vm1132_vm2  ;;  %v408_v16 = vsel %vm392_vm8, 0.0, %v1133_v31  ;;  %v1135_v59 = vmov 2e+15  }
  0xda   :  { %vm324_vm4 = vmxor %vm243_vm5, %vm1132_vm2  ;;  %v424_v28 = vadd.f32 %v408_v16, %v360_v26  ;;  %vm247_vm5 = vcmp.eq.s32.totalorder %v1356_v6, %v1303_v53 }
  0xdb   :  { %vm388_vm11 = vmand %vm239_vm1, %vm372_vm14  ;;  %vm1833_vm1 = vcmp.eq.s32.totalorder %v1305_v55, %v1303_v53  ;;  %v364_v4 = vsel %vm247_vm5, %v159_v30, 0.0  ;;  %vm240_vm14 = vcmp.eq.s32.totalorder %v1373_v14, %v1303_v53 }
  0xdc   :  { %vm344_vm13 = vmand %vm324_vm4, %vm1385_vm9  ;;  %v404_v29 = vsel %vm388_vm11, 0.0, %v1133_v31  ;;  %vm1834_vm11 = vcmp.eq.s32.totalorder %v1341_v2, %v1303_v53  ;;  %v357_v15 = vsel %vm240_vm14, %v1471_v51, 0.0 }
  0xdd   :  { %v1509_v8 = vpop.f32.mrf.mxu2  ;;  %v440_v19 = vsel %vm344_vm13, %v147_v44, -1e+15  ;;  %v420_v32 = vadd.f32 %v404_v29, %v356_v62  ;;  %vm317_vm15 = vmxor %vm1833_vm1, %vm1132_vm2  ;;  %v162_v37 = vpop.f32.mrf.mxu3 }
  0xde   :  { %v361_v11 = vsel %vm1829_vm6, %v1509_v8, 0.0  ;;  %v1520_v17 = vpop.f32.mrf.mxu0  ;;  %v1543_v1 = vpop.f32.mrf.mxu1  ;;  %vm380_vm6 = vmxor %vm312_vm7, %vm1132_vm2 }
  0xdf   :  { %554 = vmax.xlane.f32.xlu2 %v436_v12  ;;  %v354_v10 = vsel %vm1830_vm12, %v1520_v17, 0.0  ;;  %v1533_v21 = vadd.f32 %v409_v9, %v361_v11  ;;  %v358_v13 = vsel %vm1831_vm0, %v1543_v1, 0.0  ;;  %vm396_vm10 = vmand %vm247_vm5, %vm380_vm6  ;;  %v232_v44 = vpop.permute.xlu0 %231 }
  0xe0   :  { %568 = vmax.xlane.f32.xlu0 %v443_v18  ;;  %v1545_v24 = vadd.f32 %v402_v22, %v354_v10  ;;  %v1561_v27 = vadd.f32 %v406_v25, %v358_v13  ;;  %vm337_vm12 = vmand %vm317_vm15, %vm1385_vm9  ;;  %v412_v33 = vsel %vm396_vm10, 0.0, %v1133_v31 }
  0xe1   :  { %465 = vmin.xlane.f32.xlu1 %v416_v23  ;;  %vm328_vm8 = vmxor %vm247_vm5, %vm1132_vm2  ;;  %v433_v55 = vsel %vm337_vm12, %v1461_v47, -1e+15  ;;  %v428_v34 = vadd.f32 %v412_v33, %v364_v4  ;;  %vm313_vm5 = vcmp.eq.s32.totalorder %v294_v36, %v1301_v52  ;;  %vm248_vm12 = vcmp.eq.s32.totalorder %v1354_v5, %v1303_v53 }
  0xe2   :  { %vm348_vm0 = vmand %vm328_vm8, %vm1385_vm9  ;;  %v365_v39 = vsel %vm248_vm12, %v162_v37, 0.0 }
  0xe3   :  { %v444_v35 = vsel %vm348_vm0, %v159_v30, -1e+15  ;;  %vm321_vm4 = vmxor %vm240_vm14, %vm1132_vm2  ;;  %vm38_vm0 = vcmask 7168  }
  0xe4   :  { %vm325_vm7 = vmxor %vm1834_vm11, %vm1132_vm2  ;;  %59 = vst.msk [vmem:[#allocation3 + $0x20] sm:$0xff] %vm38_vm0, %v1134_v43 }
  0xe5   :  { %vm373_vm13 = vmxor %vm305_vm3, %vm1132_vm2  ;;  %55 = vst.msk [vmem:[#allocation3] sm:$0xff] %vm38_vm0, %v1134_v43  ;;  %vm1835_vm3 = vcmp.eq.s32.totalorder %v1320_v58, %v1303_v53  ;;  %v153_v14 = vpop.f32.mrf.mxu2  ;;  %v165_v49 = vpop.f32.mrf.mxu3 }
  0xe6   :  { %vm341_vm1 = vmand %vm321_vm4, %vm1385_vm9  ;;  %56 = vst.msk [vmem:[#allocation3 + $0x8] sm:$0xff] %vm38_vm0, %v1134_v43 }
  0xe7   :  { %481 = vmin.xlane.f32.xlu2 %v424_v28  ;;  %v437_v6 = vsel %vm341_vm1, %v1471_v51, -1e+15  ;;  %vm345_vm15 = vmand %vm325_vm7, %vm1385_vm9  ;;  %57 = vst.msk [vmem:[#allocation3 + $0x10] sm:$0xff] %vm38_vm0, %v1134_v43  ;;  %vm1836_vm7 = vcmp.eq.s32.totalorder %v1326_v61, %v1303_v53 }
  0xe8   :  { %562 = vmax.xlane.f32.xlu0 %v440_v19  ;;  %vm389_vm6 = vmand %vm240_vm14, %vm373_vm13  ;;  %v441_v2 = vsel %vm345_vm15, %v1509_v8, -1e+15  ;;  %58 = vst.msk [vmem:[#allocation3 + $0x18] sm:$0xff] %vm38_vm0, %v1134_v43 }
  0xe9   :  { %473 = vmin.xlane.f32.xlu1 %v420_v32  ;;  %vm381_vm10 = vmxor %vm313_vm5, %vm1132_vm2  ;;  %v405_v38 = vsel %vm389_vm6, 0.0, %v1133_v31  ;;  %60 = vst.msk [vmem:[#allocation3 + $0x28] sm:$0xff] %vm38_vm0, %v1134_v43  ;;  %vm310_vm5 = vcmp.eq.s32.totalorder %v1586_v56, %v1301_v52 }
  0xea   :  { %vm397_vm8 = vmand %vm248_vm12, %vm381_vm10  ;;  %v421_v40 = vadd.f32 %v405_v38, %v357_v15  ;;  %61 = vst.msk [vmem:[#allocation3 + $0x30] sm:$0xff] %vm38_vm0, %v1134_v43  ;;  %vm245_vm10 = vcmp.eq.s32.totalorder %v1338_v0, %v1303_v53 }
  0xeb   :  { %v413_v41 = vsel %vm397_vm8, 0.0, %v1133_v31  ;;  %vm329_vm14 = vmxor %vm248_vm12, %vm1132_vm2  ;;  %62 = vst.msk [vmem:[#allocation3 + $0x38] sm:$0xff] %vm38_vm0, %v1134_v43  ;;  %v362_v45 = vsel %vm245_vm10, %v153_v14, 0.0  ;;  %vm249_vm8 = vcmp.eq.s32.totalorder %v232_v44, %v1303_v53  ;;  %v532_v20 = vld [vmem:[#allocation3 + $0x20] sm:$0xff] }
  0xec   :  { %v429_v42 = vadd.f32 %v413_v41, %v365_v39  ;;  %vm318_vm4 = vmxor %vm1835_vm3, %vm1132_vm2  ;;  %63 = vst.msk [vmem:[#allocation3 + $0x40] sm:$0xff] %vm38_vm0, %v1134_v43  ;;  %v366_v0 = vsel %vm249_vm8, %v165_v49, 0.0  ;;  %v528_v53 = vld [vmem:[#allocation3] sm:$0xff] }
  0xed   :  { %vm349_vm11 = vmand %vm329_vm14, %vm1385_vm9  ;;  %64 = vst.msk [vmem:[#allocation3 + $0x48] sm:$0xff] %vm38_vm0, %v1134_v43  ;;  %v529_v13 = vld [vmem:[#allocation3 + $0x8] sm:$0xff] }
  0xee   :  { %vm322_vm13 = vmxor %vm1836_vm7, %vm1132_vm2  ;;  %v445_v5 = vsel %vm349_vm11, %v162_v37, -1e+15  ;;  %65 = vst.msk [vmem:[#allocation3 + $0x50] sm:$0xff] %vm38_vm0, %v1134_v43 }
  0xef   :  { %548 = vmax.xlane.f32.xlu2 %v433_v55  ;;  %vm338_vm1 = vmand %vm318_vm4, %vm1385_vm9  ;;  %66 = vst.msk [vmem:[#allocation3 + $0x58] sm:$0xff] %vm38_vm0, %v1134_v43  ;;  %vm314_vm4 = vcmp.eq.s32.totalorder %v297_v48, %v1301_v52 }
  0xf0   :  { %489 = vmin.xlane.f32.xlu0 %v428_v34  ;;  %v434_v58 = vsel %vm338_vm1, %v1520_v17, -1e+15  ;;  %vm342_vm15 = vmand %vm322_vm13, %vm1385_vm9  ;;  %67 = vst.msk [vmem:[#allocation3 + $0x60] sm:$0xff] %vm38_vm0, %v1134_v43  ;;  %v533_v19 = vld [vmem:[#allocation3 + $0x28] sm:$0xff] }
  0xf1   :  { %570 = vmax.xlane.f32.xlu1 %v444_v35  ;;  %vm378_vm6 = vmxor %vm310_vm5, %vm1132_vm2  ;;  %v438_v61 = vsel %vm342_vm15, %v1543_v1, -1e+15  ;;  %68 = vst.msk [vmem:[#allocation3 + $0x68] sm:$0xff] %vm38_vm0, %v1134_v43 }
  0xf2   :  { %vm394_vm12 = vmand %vm245_vm10, %vm378_vm6  ;;  %69 = vst.msk [vmem:[#allocation3 + $0x70] sm:$0xff] %vm38_vm0, %v1134_v43 }
  0xf3   :  { %v410_v46 = vsel %vm394_vm12, 0.0, %v1133_v31  ;;  %70 = vst.msk [vmem:[#allocation3 + $0x78] sm:$0xff] %vm38_vm0, %v1134_v43  ;;  %vm326_vm14 = vmxor %vm245_vm10, %vm1132_vm2  ;;  %v536_v7 = vld [vmem:[#allocation3 + $0x40] sm:$0xff] }
  0xf4   :  { %v426_v47 = vadd.f32 %v410_v46, %v362_v45  ;;  %vm330_vm3 = vmxor %vm249_vm8, %vm1132_vm2  ;;  %47 = vst.msk [vmem:[#allocation2 + $0x40] sm:$0xff] %vm38_vm0, %v1135_v59 }
  0xf5   :  { %vm346_vm11 = vmand %vm326_vm14, %vm1385_vm9  ;;  %39 = vst.msk [vmem:[#allocation2] sm:$0xff] %vm38_vm0, %v1135_v59 }
  0xf6   :  { %v442_v50 = vsel %vm346_vm11, %v153_v14, -1e+15  ;;  %vm350_vm7 = vmand %vm330_vm3, %vm1385_vm9  ;;  %40 = vst.msk [vmem:[#allocation2 + $0x8] sm:$0xff] %vm38_vm0, %v1135_v59 }
  0xf7   :  { %467 = vmin.xlane.f32.xlu2 %v1475_v54  ;;  %v446_v51 = vsel %vm350_vm7, %v165_v49, -1e+15  ;;  %vm382_vm13 = vmxor %vm314_vm4, %vm1132_vm2  ;;  %41 = vst.msk [vmem:[#allocation2 + $0x10] sm:$0xff] %vm38_vm0, %v1135_v59  ;;  %v540_v30 = vld [vmem:[#allocation3 + $0x60] sm:$0xff] }
  0xf8   :  { %556 = vmax.xlane.f32.xlu0 %v437_v6  ;;  %vm398_vm5 = vmand %vm249_vm8, %vm382_vm13  ;;  %42 = vst.msk [vmem:[#allocation2 + $0x18] sm:$0xff] %vm38_vm0, %v1135_v59 }
  0xf9   :  { %564 = vmax.xlane.f32.xlu1 %v441_v2  ;;  %v414_v52 = vsel %vm398_vm5, 0.0, %v1133_v31  ;;  %43 = vst.msk [vmem:[#allocation2 + $0x20] sm:$0xff] %vm38_vm0, %v1135_v59 }
  0xfa   :  { %v430_v54 = vadd.f32 %v414_v52, %v366_v0  ;;  %44 = vst.msk [vmem:[#allocation2 + $0x28] sm:$0xff] %vm38_vm0, %v1135_v59  ;;  %v530_v0 = vld [vmem:[#allocation3 + $0x10] sm:$0xff]  ;;  %v1136_v52 = vmov 0.0  }
  0xfb   :  { %45 = vst.msk [vmem:[#allocation2 + $0x30] sm:$0xff] %vm38_vm0, %v1135_v59  ;;  %v455_v12 = vld [vmem:[#allocation2 + $0x40] sm:$0xff] }
  0xfc   :  { %46 = vst.msk [vmem:[#allocation2 + $0x38] sm:$0xff] %vm38_vm0, %v1135_v59  ;;  %v447_v8 = vld [vmem:[#allocation2] sm:$0xff] }
  0xfd   :  { %48 = vst.msk [vmem:[#allocation2 + $0x48] sm:$0xff] %vm38_vm0, %v1135_v59  ;;  %v448_v55 = vld [vmem:[#allocation2 + $0x8] sm:$0xff] }
  0xfe   :  { %49 = vst.msk [vmem:[#allocation2 + $0x50] sm:$0xff] %vm38_vm0, %v1135_v59 }
  0xff   :  { %475 = vmin.xlane.f32.xlu2 %v421_v40  ;;  %50 = vst.msk [vmem:[#allocation2 + $0x58] sm:$0xff] %vm38_vm0, %v1135_v59  ;;  %v537_v40 = vld [vmem:[#allocation3 + $0x48] sm:$0xff] }
 0x100   :  { %483 = vmin.xlane.f32.xlu0 %v1533_v21  ;;  %51 = vst.msk [vmem:[#allocation2 + $0x60] sm:$0xff] %vm38_vm0, %v1135_v59  ;;  %v451_v22 = vld [vmem:[#allocation2 + $0x20] sm:$0xff] }
 0x101   :  { %491 = vmin.xlane.f32.xlu1 %v429_v42  ;;  %52 = vst.msk [vmem:[#allocation2 + $0x68] sm:$0xff] %vm38_vm0, %v1135_v59  ;;  %v452_v14 = vld [vmem:[#allocation2 + $0x28] sm:$0xff] }
 0x102   :  { %53 = vst.msk [vmem:[#allocation2 + $0x70] sm:$0xff] %vm38_vm0, %v1135_v59 }
 0x103   :  { %54 = vst.msk [vmem:[#allocation2 + $0x78] sm:$0xff] %vm38_vm0, %v1135_v59 }
 0x104   :  { %v456_v38 = vld [vmem:[#allocation2 + $0x48] sm:$0xff] }
 0x107   :  { %572 = vmax.xlane.f32.xlu2 %v445_v5  ;;  %v459_v21 = vld [vmem:[#allocation2 + $0x60] sm:$0xff] }
 0x108   :  { %550 = vmax.xlane.f32.xlu0 %v434_v58 }
 0x109   :  { %558 = vmax.xlane.f32.xlu1 %v438_v61 }
 0x10f   :  { %469 = vmin.xlane.f32.xlu2 %v1545_v24 }
 0x110   :  { %477 = vmin.xlane.f32.xlu0 %v1561_v27 }
 0x111   :  { %485 = vmin.xlane.f32.xlu1 %v426_v47 }
 0x117   :  { %566 = vmax.xlane.f32.xlu2 %v442_v50 }
 0x118   :  { %574 = vmax.xlane.f32.xlu0 %v446_v51 }
 0x11f   :  { %493 = vmin.xlane.f32.xlu2 %v430_v54 }
 0x13b   :  { %v545_v31 = vpop.xlane.xlu0 %544  ;;  %v553_v60 = vpop.xlane.xlu1 %552 }
 0x13c   :  { %v576_v57 = vmax.f32 %v528_v53, %v545_v31  ;;  %v580_v63 = vmax.f32 %v532_v20, %v553_v60  ;;  %v460_v53 = vld [vmem:[#allocation2 + $0x68] sm:$0xff] }
 0x13e   :  { %592 = vst.msk [vmem:[#allocation3] sm:$0xff] %vm38_vm0, %v576_v57 }
 0x13f   :  { %596 = vst.msk [vmem:[#allocation3 + $0x20] sm:$0xff] %vm38_vm0, %v580_v63 }
 0x142   :  { %v561_v9 = vpop.xlane.xlu2 %560 }
 0x143   :  { %v584_v11 = vmax.f32 %v536_v7, %v561_v9  ;;  %v464_v17 = vpop.xlane.xlu0 %463 }
 0x144   :  { %v495_v3 = vmin.f32 %v447_v8, %v464_v17  ;;  %v480_v10 = vpop.xlane.xlu1 %479  ;;  %v541_v8 = vld [vmem:[#allocation3 + $0x68] sm:$0xff] }
 0x145   :  { %600 = vst.msk [vmem:[#allocation3 + $0x40] sm:$0xff] %vm38_vm0, %v584_v11  ;;  %v503_v18 = vmin.f32 %v455_v12, %v480_v10  ;;  %v627_v16 = vld [vmem:[#allocation3] sm:$0xff] }
 0x146   :  { %512 = vst.msk [vmem:[#allocation2] sm:$0xff] %vm38_vm0, %v495_v3  ;;  %v631_v6 = vld [vmem:[#allocation3 + $0x20] sm:$0xff] }
 0x147   :  { %520 = vst.msk [vmem:[#allocation2 + $0x40] sm:$0xff] %vm38_vm0, %v503_v18  ;;  %v449_v18 = vld [vmem:[#allocation2 + $0x10] sm:$0xff] }
 0x14a   :  { %v488_v1 = vpop.xlane.xlu2 %487 }
 0x14b   :  { %v507_v23 = vmin.f32 %v459_v21, %v488_v1  ;;  %v472_v24 = vpop.xlane.xlu0 %471 }
 0x14c   :  { %v499_v25 = vmin.f32 %v451_v22, %v472_v24  ;;  %v547_v26 = vpop.xlane.xlu1 %546  ;;  %v1733_v41 = vld [vmem:[#allocation3 + $0x40] sm:$0xff] }
 0x14d   :  { %524 = vst.msk [vmem:[#allocation2 + $0x60] sm:$0xff] %vm38_vm0, %v507_v23  ;;  %v611_v27 = vld [vmem:[#allocation2] sm:$0xff]  ;;  %v577_v62 = vmax.f32 %v529_v13, %v547_v26  ;;  %v534_v23 = vld [vmem:[#allocation3 + $0x30] sm:$0xff] }
 0x14e   :  { %516 = vst.msk [vmem:[#allocation2 + $0x20] sm:$0xff] %vm38_vm0, %v499_v25  ;;  %v643_v28 = vsub.f32 %v627_v16, %v611_v27  ;;  %v1730_v37 = vld [vmem:[#allocation2 + $0x40] sm:$0xff]  ;;  %vm691_vm2 = vcmp.ge.f32.partialorder %v611_v27, %v627_v16 }
 0x14f   :  { %593 = vst.msk [vmem:[#allocation3 + $0x8] sm:$0xff] %vm38_vm0, %v577_v62  ;;  %v651_v5 = vsub.f32 %v1733_v41, %v1730_v37  ;;  %v950_v54 = vsel %vm691_vm2, 1.0, %v1136_v52  ;;  %vm699_vm12 = vcmp.ge.f32.partialorder %v1730_v37, %v1733_v41  ;;  %v461_v41 = vld [vmem:[#allocation2 + $0x70] sm:$0xff] }
 0x150   :  { %v659_v29 = vadd.f32 16.0, %v643_v28 }
 0x151   :  { %v667_v49 = vadd.f32 16.0, %v651_v5 }
 0x152   :  { %v555_v32 = vpop.xlane.xlu2 %554  ;;  %v675_v56 = vmax.f32 %v659_v29, 0.0 }
 0x153   :  { %v581_v4 = vmax.f32 %v533_v19, %v555_v32  ;;  %v569_v33 = vpop.xlane.xlu0 %568  ;;  %v683_v57 = vmax.f32 %v667_v49, 0.0  ;;  %v538_v19 = vld [vmem:[#allocation3 + $0x50] sm:$0xff] }
 0x154   :  { %v588_v34 = vmax.f32 %v540_v30, %v569_v33  ;;  %741 = vperm.xlu1 %1033, %v675_v56   ;;  %v466_v35 = vpop.xlane.xlu1 %465  ;;  %v1738_v46 = vld [vmem:[#allocation2 + $0x60] sm:$0xff]  ;;  %v542_v49 = vld [vmem:[#allocation3 + $0x70] sm:$0xff] }
 0x155   :  { %597 = vst.msk [vmem:[#allocation3 + $0x28] sm:$0xff] %vm38_vm0, %v581_v4  ;;  %v615_v36 = vld [vmem:[#allocation2 + $0x20] sm:$0xff]  ;;  %v496_v2 = vmin.f32 %v448_v55, %v466_v35 }
 0x156   :  { %604 = vst.msk [vmem:[#allocation3 + $0x60] sm:$0xff] %vm38_vm0, %v588_v34  ;;  %v647_v15 = vsub.f32 %v631_v6, %v615_v36  ;;  %v628_v51 = vld [vmem:[#allocation3 + $0x8] sm:$0xff]  ;;  %vm695_vm15 = vcmp.ge.f32.partialorder %v615_v36, %v631_v6  ;;  %v453_v36 = vld [vmem:[#allocation2 + $0x30] sm:$0xff] }
 0x157   :  { %513 = vst.msk [vmem:[#allocation2 + $0x8] sm:$0xff] %vm38_vm0, %v496_v2  ;;  %v954_v22 = vsel %vm695_vm15, 1.0, %v1136_v52  ;;  %v457_v2 = vld [vmem:[#allocation2 + $0x50] sm:$0xff] }
 0x158   :  { %v663_v39 = vadd.f32 16.0, %v647_v15  ;;  %v958_v15 = vsel %vm699_vm12, 1.0, %v1136_v52 }
 0x15a   :  { %v482_v42 = vpop.xlane.xlu2 %481  ;;  %v679_v43 = vmax.f32 %v663_v39, 0.0 }
 0x15b   :  { %v504_v58 = vmin.f32 %v456_v38, %v482_v42  ;;  %v563_v61 = vpop.xlane.xlu0 %562 }
 0x15c   :  { %v585_v44 = vmax.f32 %v537_v40, %v563_v61  ;;  %761 = vperm.xlu2 %1034, %v679_v43   ;;  %v474_v45 = vpop.xlane.xlu1 %473  ;;  %v632_v10 = vld [vmem:[#allocation3 + $0x28] sm:$0xff] }
 0x15d   :  { %521 = vst.msk [vmem:[#allocation2 + $0x48] sm:$0xff] %vm38_vm0, %v504_v58  ;;  %v1740_v47 = vld [vmem:[#allocation3 + $0x60] sm:$0xff]  ;;  %v500_v48 = vmin.f32 %v452_v14, %v474_v45 }
 0x15e   :  { %601 = vst.msk [vmem:[#allocation3 + $0x48] sm:$0xff] %vm38_vm0, %v585_v44  ;;  %vm703_vm9 = vcmp.ge.f32.partialorder %v1738_v46, %v1740_v47  ;;  %v612_v50 = vld [vmem:[#allocation2 + $0x8] sm:$0xff]  ;;  %v655_v16 = vsub.f32 %v1740_v47, %v1738_v46 }
 0x15f   :  { %517 = vst.msk [vmem:[#allocation2 + $0x28] sm:$0xff] %vm38_vm0, %v500_v48  ;;  %vm692_vm1 = vcmp.ge.f32.partialorder %v612_v50, %v628_v51  ;;  %v644_v60 = vsub.f32 %v628_v51, %v612_v50  ;;  %v531_v50 = vld [vmem:[#allocation3 + $0x18] sm:$0xff] }
 0x160   :  { %v951_v59 = vsel %vm692_vm1, 1.0, %v1136_v52  ;;  %v671_v55 = vadd.f32 16.0, %v655_v16 }
 0x161   :  { %v1035_v31 = vpack.i.bf16 %v951_v59, %v950_v54  ;;  %v660_v17 = vadd.f32 16.0, %v644_v60 }
 0x162   :  { %v549_v20 = vpop.xlane.xlu2 %548  ;;  %v687_v39 = vmax.f32 %v671_v55, 0.0 }
 0x163   :  { %v578_v63 = vmax.f32 %v530_v0, %v549_v20  ;;  %v490_v7 = vpop.xlane.xlu0 %489  ;;  %1036 = vperm.xlu1 %1033, %v1035_v31   ;;  %v676_v26 = vmax.f32 %v660_v17, 0.0  ;;  %v535_v20 = vld [vmem:[#allocation3 + $0x38] sm:$0xff] }
 0x164   :  { %v508_v9 = vmin.f32 %v460_v53, %v490_v7  ;;  %781 = vperm.xlu2 %1034, %v683_v57   ;;  %v571_v11 = vpop.xlane.xlu1 %570  ;;  %v620_v29 = vld [vmem:[#allocation2 + $0x48] sm:$0xff]  ;;  %v450_v17 = vld [vmem:[#allocation2 + $0x18] sm:$0xff] }
 0x165   :  { %594 = vst.msk [vmem:[#allocation3 + $0x10] sm:$0xff] %vm38_vm0, %v578_v63  ;;  %v589_v12 = vmax.f32 %v541_v8, %v571_v11  ;;  %v636_v24 = vld [vmem:[#allocation3 + $0x48] sm:$0xff] }
 0x166   :  { %525 = vst.msk [vmem:[#allocation2 + $0x68] sm:$0xff] %vm38_vm0, %v508_v9  ;;  %v616_v3 = vld [vmem:[#allocation2 + $0x28] sm:$0xff]  ;;  %vm700_vm10 = vcmp.ge.f32.partialorder %v620_v29, %v636_v24  ;;  %v652_v43 = vsub.f32 %v636_v24, %v620_v29 }
 0x167   :  { %605 = vst.msk [vmem:[#allocation3 + $0x68] sm:$0xff] %vm38_vm0, %v589_v12  ;;  %vm696_vm6 = vcmp.ge.f32.partialorder %v616_v3, %v632_v10  ;;  %v648_v21 = vsub.f32 %v632_v10, %v616_v3  ;;  %v959_v34 = vsel %vm700_vm10, 1.0, %v1136_v52  ;;  %v454_v10 = vld [vmem:[#allocation2 + $0x38] sm:$0xff] }
 0x168   :  { %v955_v1 = vsel %vm696_vm6, 1.0, %v1136_v52  ;;  %v1045_v40 = vpack.i.bf16 %v959_v34, %v958_v15  ;;  %v668_v45 = vadd.f32 16.0, %v652_v43 }
 0x169   :  { %v1040_v25 = vpack.i.bf16 %v955_v1, %v954_v22  ;;  %v664_v27 = vadd.f32 16.0, %v648_v21  ;;  %v458_v1 = vld [vmem:[#allocation2 + $0x58] sm:$0xff] }
 0x16a   :  { %v468_v13 = vpop.xlane.xlu2 %467  ;;  %v684_v54 = vmax.f32 %v668_v45, 0.0 }
 0x16b   :  { %v497_v62 = vmin.f32 %v449_v18, %v468_v13  ;;  %v557_v28 = vpop.xlane.xlu0 %556  ;;  %1041 = vperm.xlu0 %1032, %v1040_v25   ;;  %v680_v32 = vmax.f32 %v664_v27, 0.0  ;;  %v543_v27 = vld [vmem:[#allocation3 + $0x78] sm:$0xff] }
 0x16c   :  { %v582_v30 = vmax.f32 %v534_v23, %v557_v28  ;;  %746 = vperm.xlu2 %1034, %v676_v26   ;;  %v565_v56 = vpop.xlane.xlu1 %564  ;;  %v629_v51 = vld [vmem:[#allocation3 + $0x10] sm:$0xff]  ;;  %v539_v26 = vld [vmem:[#allocation3 + $0x58] sm:$0xff] }
 0x16d   :  { %514 = vst.msk [vmem:[#allocation2 + $0x10] sm:$0xff] %vm38_vm0, %v497_v62  ;;  %v1756_v4 = vld [vmem:[#allocation2 + $0x68] sm:$0xff]  ;;  %v586_v33 = vmax.f32 %v538_v19, %v565_v56  ;;  %766 = vperm.xlu1 %1033, %v680_v32  }
 0x16e   :  { %598 = vst.msk [vmem:[#allocation3 + $0x30] sm:$0xff] %vm38_vm0, %v582_v30  ;;  %v1762_v35 = vld [vmem:[#allocation3 + $0x68] sm:$0xff] }
 0x16f   :  { %602 = vst.msk [vmem:[#allocation3 + $0x50] sm:$0xff] %vm38_vm0, %v586_v33  ;;  %v656_v6 = vsub.f32 %v1762_v35, %v1756_v4  ;;  %vm704_vm5 = vcmp.ge.f32.partialorder %v1756_v4, %v1762_v35 }
 0x171   :  { %v672_v42 = vadd.f32 16.0, %v656_v6 }
 0x172   :  { %v476_v38 = vpop.xlane.xlu2 %475 }
 0x173   :  { %v501_v5 = vmin.f32 %v453_v36, %v476_v38  ;;  %v484_v37 = vpop.xlane.xlu0 %483  ;;  %801 = vperm.xlu0 %1032, %v687_v39   ;;  %v688_v61 = vmax.f32 %v672_v42, 0.0  ;;  %v462_v42 = vld [vmem:[#allocation2 + $0x78] sm:$0xff] }
 0x174   :  { %v505_v58 = vmin.f32 %v457_v2, %v484_v37  ;;  %1046 = vperm.xlu2 %1034, %v1045_v40   ;;  %v492_v14 = vpop.xlane.xlu1 %491  ;;  %v613_v48 = vld [vmem:[#allocation2 + $0x10] sm:$0xff] }
 0x175   :  { %518 = vst.msk [vmem:[#allocation2 + $0x30] sm:$0xff] %vm38_vm0, %v501_v5  ;;  %v509_v44 = vmin.f32 %v461_v41, %v492_v14  ;;  %806 = vperm.xlu1 %1033, %v688_v61   ;;  %v645_v59 = vsub.f32 %v629_v51, %v613_v48  ;;  %v633_v63 = vld [vmem:[#allocation3 + $0x30] sm:$0xff]  ;;  %vm693_vm8 = vcmp.ge.f32.partialorder %v613_v48, %v629_v51 }
 0x176   :  { %522 = vst.msk [vmem:[#allocation2 + $0x50] sm:$0xff] %vm38_vm0, %v505_v58  ;;  %v952_v34 = vsel %vm693_vm8, 1.0, %v1136_v52  ;;  %v637_v40 = vld [vmem:[#allocation3 + $0x50] sm:$0xff] }
 0x177   :  { %526 = vst.msk [vmem:[#allocation2 + $0x70] sm:$0xff] %vm38_vm0, %v509_v44  ;;  %v661_v11 = vadd.f32 16.0, %v645_v59 }
 0x179   :  { %v677_v21 = vmax.f32 %v661_v11, 0.0 }
 0x17a   :  { %v573_v0 = vpop.xlane.xlu2 %572 }
 0x17b   :  { %v590_v53 = vmax.f32 %v542_v49, %v573_v0  ;;  %v551_v31 = vpop.xlane.xlu0 %550  ;;  %786 = vperm.xlu0 %1032, %v684_v54  }
 0x17c   :  { %v579_v57 = vmax.f32 %v531_v50, %v551_v31  ;;  %v617_v60 = vld [vmem:[#allocation2 + $0x30] sm:$0xff]  ;;  %v559_v7 = vpop.xlane.xlu1 %558 }
 0x17d   :  { %606 = vst.msk [vmem:[#allocation3 + $0x70] sm:$0xff] %vm38_vm0, %v590_v53  ;;  %v649_v8 = vsub.f32 %v633_v63, %v617_v60  ;;  %v583_v9 = vmax.f32 %v535_v20, %v559_v7  ;;  %vm697_vm14 = vcmp.ge.f32.partialorder %v617_v60, %v633_v63  ;;  %v621_v55 = vld [vmem:[#allocation2 + $0x50] sm:$0xff] }
 0x17e   :  { %595 = vst.msk [vmem:[#allocation3 + $0x18] sm:$0xff] %vm38_vm0, %v579_v57  ;;  %v625_v6 = vld [vmem:[#allocation2 + $0x70] sm:$0xff]  ;;  %v956_v15 = vsel %vm697_vm14, 1.0, %v1136_v52  ;;  %v653_v5 = vsub.f32 %v637_v40, %v621_v55  ;;  %vm701_vm13 = vcmp.ge.f32.partialorder %v621_v55, %v637_v40 }
 0x17f   :  { %v665_v12 = vadd.f32 16.0, %v649_v8  ;;  %599 = vst.msk [vmem:[#allocation3 + $0x38] sm:$0xff] %vm38_vm0, %v583_v9 }
 0x180   :  { %v669_v61 = vadd.f32 16.0, %v653_v5 }
 0x181   :  { %v681_v3 = vmax.f32 %v665_v12, 0.0 }
 0x182   :  { %v470_v18 = vpop.xlane.xlu2 %469  ;;  %v685_v49 = vmax.f32 %v669_v61, 0.0 }
 0x183   :  { %v498_v22 = vmin.f32 %v450_v17, %v470_v18  ;;  %771 = vperm.xlu2 %1034, %v681_v3   ;;  %v478_v23 = vpop.xlane.xlu0 %477  ;;  %751 = vperm.xlu0 %1032, %v677_v21   ;;  %v960_v17 = vsel %vm701_vm13, 1.0, %v1136_v52  ;;  %v963_v18 = vsel %vm704_vm5, 1.0, %v1136_v52  ;;  %v962_v21 = vsel %vm703_vm9, 1.0, %v1136_v52 }
 0x184   :  { %v502_v24 = vmin.f32 %v454_v10, %v478_v23  ;;  %v486_v13 = vpop.xlane.xlu1 %485  ;;  %v641_v32 = vld [vmem:[#allocation3 + $0x70] sm:$0xff] }
 0x185   :  { %515 = vst.msk [vmem:[#allocation2 + $0x18] sm:$0xff] %vm38_vm0, %v498_v22  ;;  %v506_v25 = vmin.f32 %v458_v1, %v486_v13  ;;  %v630_v30 = vld [vmem:[#allocation3 + $0x18] sm:$0xff]  ;;  %v657_v39 = vsub.f32 %v641_v32, %v625_v6  ;;  %v1065_v22 = vpack.i.bf16 %v963_v18, %v962_v21 }
 0x186   :  { %519 = vst.msk [vmem:[#allocation2 + $0x38] sm:$0xff] %vm38_vm0, %v502_v24  ;;  %v634_v33 = vld [vmem:[#allocation3 + $0x38] sm:$0xff] }
 0x187   :  { %523 = vst.msk [vmem:[#allocation2 + $0x58] sm:$0xff] %vm38_vm0, %v506_v25  ;;  %v673_v58 = vadd.f32 16.0, %v657_v39 }
 0x189   :  { %v689_v45 = vmax.f32 %v673_v58, 0.0 }
 0x18a   :  { %v567_v16 = vpop.xlane.xlu2 %566 }
 0x18b   :  { %v587_v62 = vmax.f32 %v539_v26, %v567_v16  ;;  %v575_v28 = vpop.xlane.xlu0 %574 }
 0x18c   :  { %v591_v19 = vmax.f32 %v543_v27, %v575_v28  ;;  %v614_v29 = vld [vmem:[#allocation2 + $0x18] sm:$0xff] }
 0x18d   :  { %603 = vst.msk [vmem:[#allocation3 + $0x58] sm:$0xff] %vm38_vm0, %v587_v62  ;;  %vm694_vm3 = vcmp.ge.f32.partialorder %v614_v29, %v630_v30  ;;  %v618_v56 = vld [vmem:[#allocation2 + $0x38] sm:$0xff]  ;;  %v646_v50 = vsub.f32 %v630_v30, %v614_v29 }
 0x18e   :  { %607 = vst.msk [vmem:[#allocation3 + $0x78] sm:$0xff] %vm38_vm0, %v591_v19  ;;  %v953_v36 = vsel %vm694_vm3, 1.0, %v1136_v52  ;;  %vm698_vm4 = vcmp.ge.f32.partialorder %v618_v56, %v634_v33  ;;  %v622_v44 = vld [vmem:[#allocation2 + $0x58] sm:$0xff]  ;;  %v650_v60 = vsub.f32 %v634_v33, %v618_v56 }
 0x18f   :  { %v1050_v2 = vpack.i.bf16 %v953_v36, %v952_v34  ;;  %v957_v38 = vsel %vm698_vm4, 1.0, %v1136_v52  ;;  %v662_v59 = vadd.f32 16.0, %v646_v50 }
 0x190   :  { %v1055_v43 = vpack.i.bf16 %v957_v38, %v956_v15  ;;  %v666_v8 = vadd.f32 16.0, %v650_v60 }
 0x191   :  { %1051 = vperm.xlu2 %1034, %v1050_v2   ;;  %v678_v57 = vmax.f32 %v662_v59, 0.0 }
 0x192   :  { %v494_v37 = vpop.xlane.xlu2 %493  ;;  %1056 = vperm.xlu1 %1033, %v1055_v43   ;;  %v682_v3 = vmax.f32 %v666_v8, 0.0 }
 0x193   :  { %v510_v41 = vmin.f32 %v462_v42, %v494_v37 }
 0x194   :  { %v638_v14 = vld [vmem:[#allocation3 + $0x58] sm:$0xff] }
 0x195   :  { %527 = vst.msk [vmem:[#allocation2 + $0x78] sm:$0xff] %vm38_vm0, %v510_v41  ;;  %v654_v48 = vsub.f32 %v638_v14, %v622_v44  ;;  %v642_v54 = vld [vmem:[#allocation3 + $0x78] sm:$0xff]  ;;  %vm705_vm0 = vcmp.ge.f32.partialorder %v625_v6, %v641_v32  ;;  %vm702_vm7 = vcmp.ge.f32.partialorder %v622_v44, %v638_v14 }
 0x196   :  { %v964_v9 = vsel %vm705_vm0, 1.0, %v1136_v52  ;;  %v961_v11 = vsel %vm702_vm7, 1.0, %v1136_v52 }
 0x197   :  { %v670_v51 = vadd.f32 16.0, %v654_v48  ;;  %v1060_v10 = vpack.i.bf16 %v961_v11, %v960_v17 }
 0x199   :  { %811 = vperm.xlu2 %1034, %v689_v45   ;;  %v686_v20 = vmax.f32 %v670_v51, 0.0 }
 0x19a   :  { %791 = vperm.xlu1 %1033, %v685_v49  }
 0x19c   :  { %v626_v0 = vld [vmem:[#allocation2 + $0x78] sm:$0xff] }
 0x19d   :  { %v658_v53 = vsub.f32 %v642_v54, %v626_v0  ;;  %vm706_vm11 = vcmp.ge.f32.partialorder %v626_v0, %v642_v54 }
 0x19e   :  { %v965_v7 = vsel %vm706_vm11, 1.0, %v1136_v52 }
 0x19f   :  { %v674_v31 = vadd.f32 16.0, %v658_v53  ;;  %v1070_v12 = vpack.i.bf16 %v965_v7, %v964_v9 }
 0x1a1   :  { %796 = vperm.xlu2 %1034, %v686_v20   ;;  %v690_v63 = vmax.f32 %v674_v31, 0.0 }
 0x1a2   :  { %756 = vperm.xlu1 %1033, %v678_v57  }
 0x1a3   :  { %816 = vperm.xlu0 %1032, %v690_v63  }
 0x1a9   :  { %1071 = vperm.xlu2 %1034, %v1070_v12  }
 0x1aa   :  { %776 = vperm.xlu1 %1033, %v682_v3  }
 0x1ab   :  { %1061 = vperm.xlu0 %1032, %v1060_v10  }
 0x1b2   :  { %1066 = vperm.xlu1 %1033, %v1065_v22  }
 0x1b6   :  { %v762_v1 = vpop.permute.xlu2 %761 }
 0x1b7   :  { %823 = vst [vmem:[#allocation7 + $0x40] sm:$0xff] %v762_v1 }
 0x1be   :  { %v782_v23 = vpop.permute.xlu2 %781 }
 0x1bf   :  { %827 = vst [vmem:[#allocation7 + $0x80] sm:$0xff] %v782_v23 }
 0x1c6   :  { %v747_v24 = vpop.permute.xlu2 %746  ;;  %v742_v13 = vpop.permute.xlu1 %741 }
 0x1c7   :  { %820 = vst [vmem:[#allocation7 + $0x10] sm:$0xff] %v747_v24 }
 0x1c8   :  { %819 = vst [vmem:[#allocation7] sm:$0xff] %v742_v13 }
 0x1ce   :  { %v1047_v25 = vpop.permute.xlu2 %1046 }
 0x1cf   :  { %v1049_v4 = vunpack.i.h.bf16 %v1047_v25  ;;  %v1048_v35 = vunpack.i.l.bf16 %v1047_v25 }
 0x1d1   :  { %924 = vst [vmem:[#allocation7 + $0x98] sm:$0xff] %v1049_v4 }
 0x1d2   :  { %923 = vst [vmem:[#allocation7 + $0x88] sm:$0xff] %v1048_v35 }
 0x1d5   :  { %v1037_v26 = vpop.permute.xlu1 %1036 }
 0x1d6   :  { %v1039_v27 = vunpack.i.h.bf16 %v1037_v26  ;;  %v1038_v16 = vunpack.i.l.bf16 %v1037_v26 }
 0x1d8   :  { %916 = vst [vmem:[#allocation7 + $0x18] sm:$0xff] %v1039_v27 }
 0x1d9   :  { %915 = vst [vmem:[#allocation7 + $0x8] sm:$0xff] %v1038_v16 }
 0x1dd   :  { %v772_v46 = vpop.permute.xlu2 %771  ;;  %v1042_v47 = vpop.permute.xlu0 %1041 }
 0x1de   :  { %825 = vst [vmem:[#allocation7 + $0x60] sm:$0xff] %v772_v46  ;;  %v1044_v52 = vunpack.i.h.bf16 %v1042_v47  ;;  %v1043_v62 = vunpack.i.l.bf16 %v1042_v47 }
 0x1df   :  { %v767_v28 = vpop.permute.xlu1 %766 }
 0x1e0   :  { %920 = vst [vmem:[#allocation7 + $0x58] sm:$0xff] %v1044_v52 }
 0x1e1   :  { %919 = vst [vmem:[#allocation7 + $0x48] sm:$0xff] %v1043_v62 }
 0x1e2   :  { %824 = vst [vmem:[#allocation7 + $0x50] sm:$0xff] %v767_v28 }
 0x1e5   :  { %v802_v19 = vpop.permute.xlu0 %801 }
 0x1e6   :  { %831 = vst [vmem:[#allocation7 + $0xc0] sm:$0xff] %v802_v19 }
 0x1e7   :  { %v807_v29 = vpop.permute.xlu1 %806 }
 0x1e8   :  { %832 = vst [vmem:[#allocation7 + $0xd0] sm:$0xff] %v807_v29 }
 0x1eb   :  { %v1052_v30 = vpop.permute.xlu2 %1051 }
 0x1ec   :  { %v1054_v32 = vunpack.i.h.bf16 %v1052_v30  ;;  %v1053_v56 = vunpack.i.l.bf16 %v1052_v30 }
 0x1ed   :  { %v787_v33 = vpop.permute.xlu0 %786 }
 0x1ee   :  { %918 = vst [vmem:[#allocation7 + $0x38] sm:$0xff] %v1054_v32 }
 0x1ef   :  { %917 = vst [vmem:[#allocation7 + $0x28] sm:$0xff] %v1053_v56 }
 0x1f0   :  { %828 = vst [vmem:[#allocation7 + $0x90] sm:$0xff] %v787_v33 }
 0x1f3   :  { %v812_v55 = vpop.permute.xlu2 %811 }
 0x1f4   :  { %833 = vst [vmem:[#allocation7 + $0xe0] sm:$0xff] %v812_v55 }
 0x1f5   :  { %v752_v34 = vpop.permute.xlu0 %751 }
 0x1f6   :  { %821 = vst [vmem:[#allocation7 + $0x20] sm:$0xff] %v752_v34 }
 0x1fb   :  { %v797_v36 = vpop.permute.xlu2 %796 }
 0x1fc   :  { %830 = vst [vmem:[#allocation7 + $0xb0] sm:$0xff] %v797_v36 }
 0x203   :  { %v1072_v6 = vpop.permute.xlu2 %1071 }
 0x204   :  { %v1074_v2 = vunpack.i.h.bf16 %v1072_v6  ;;  %v1073_v15 = vunpack.i.l.bf16 %v1072_v6  ;;  %v1057_v38 = vpop.permute.xlu1 %1056 }
 0x205   :  { %v1059_v39 = vunpack.i.h.bf16 %v1057_v38  ;;  %v1058_v40 = vunpack.i.l.bf16 %v1057_v38 }
 0x206   :  { %930 = vst [vmem:[#allocation7 + $0xf8] sm:$0xff] %v1074_v2 }
 0x207   :  { %929 = vst [vmem:[#allocation7 + $0xe8] sm:$0xff] %v1073_v15 }
 0x208   :  { %922 = vst [vmem:[#allocation7 + $0x78] sm:$0xff] %v1059_v39 }
 0x209   :  { %921 = vst [vmem:[#allocation7 + $0x68] sm:$0xff] %v1058_v40 }
 0x20c   :  { %v792_v42 = vpop.permute.xlu1 %791 }
 0x20d   :  { %829 = vst [vmem:[#allocation7 + $0xa0] sm:$0xff] %v792_v42 }
 0x214   :  { %v757_v43 = vpop.permute.xlu1 %756 }
 0x215   :  { %v817_v5 = vpop.permute.xlu0 %816  ;;  %822 = vst [vmem:[#allocation7 + $0x30] sm:$0xff] %v757_v43 }
 0x216   :  { %834 = vst [vmem:[#allocation7 + $0xf0] sm:$0xff] %v817_v5 }
 0x21c   :  { %v777_v37 = vpop.permute.xlu1 %776 }
 0x21d   :  { %v1062_v41 = vpop.permute.xlu0 %1061  ;;  %826 = vst [vmem:[#allocation7 + $0x70] sm:$0xff] %v777_v37 }
 0x21e   :  { %v1064_v58 = vunpack.i.h.bf16 %v1062_v41  ;;  %v1063_v61 = vunpack.i.l.bf16 %v1062_v41 }
 0x220   :  { %926 = vst [vmem:[#allocation7 + $0xb8] sm:$0xff] %v1064_v58 }
 0x221   :  { %925 = vst [vmem:[#allocation7 + $0xa8] sm:$0xff] %v1063_v61 }
 0x224   :  { %v1067_v14 = vpop.permute.xlu1 %1066 }
 0x225   :  { %v1069_v44 = vunpack.i.h.bf16 %v1067_v14  ;;  %v1068_v45 = vunpack.i.l.bf16 %v1067_v14 }
 0x227   :  { %928 = vst [vmem:[#allocation7 + $0xd8] sm:$0xff] %v1069_v44 }
 0x228   :  { %927 = vst [vmem:[#allocation7 + $0xc8] sm:$0xff] %v1068_v45 }
 0x229   :  { %943 = dma.vmem_to_hbm [thread:$0]  %s936_s3, 4096, %s938_s8, [#allocation6], %s1138_s9, %s1138_s9, %s1139_s10  }
 0x22a   :  { %1125 = dma.done.wait [#allocation6], 4096  }
 0x22b   :  { %1126 = vsyncadd [#allocation6], 4294963200 }
 0x22c   :  { %948 = vsyncpa [#allocation5], 1 }
 0x22d   :  { %949 = vsyncpa [#allocation6], 1 }

</bundles_post_ra>
